<compile_context>
chip_gen: v5e
topology: v5e:2x2
jax: 0.10.0
libtpu: 0.0.40
codegen_flags: <defaults>
</compile_context>

<pallas_src>
import functools

import jax
import jax.numpy as jnp
from jax import lax
from jax.experimental import pallas as pl
from jax.experimental.pallas import tpu as pltpu


def _round_up(x, m):
    return (x + m - 1) // m * m


def _cdiv(a, b):
    return (a + b - 1) // b


def _tensorcores_per_chip():
    """2 on v7x (so we keep 2 'parallel' grid steps), else 1."""
    try:
        kind = jax.devices()[0].device_kind.lower()
    except Exception:
        return 1
    return 2 if ("v7" in kind or "tpu7" in kind) else 1


def _noblock_kernel(x_ref, mask_ref, w1_ref, w2_ref, out_ref, win_ref, mid_ref,
                    *, NB, Wp, L, OFF, Cp, LE):
    """NB batch images per grid step, folded into the lane axis.

    x_ref   : (NB, Cp, LE) f32  zero-padded images, spatial flattened as
                                (c, y*Wp + x), with an OFF-lane zero halo on
                                both sides (built host-side via jnp.pad).
    mask_ref: (1, NB*L)    f32  1.0 at interior (valid) flattened positions.
    w1_ref  : (Cp, 9*Cp)   f32  conv1 tap slab, columns [t*Cp + c_in], t=ky*3+kx.
    w2_ref  : (Cp, 9*Cp)   f32  conv2 tap slab.
    out_ref : (NB, Cp, L)
    win_ref : VMEM (9*Cp, NB*L) staged shifted windows (matmul K axis).
    mid_ref : VMEM (Cp, NB*LE)  relu(conv1) intermediate with per-image halo.

    Correctness invariant (do NOT remove the mask multiply or shrink OFF/L):
    a lane-shifted window "wraps" across row edges of the flattened frame, but
    every wrapped-in element is either (a) part of the zero padding ring /
    zeroed halo, or (b) only feeds ring/tail output positions the host crops.
    """
    shifts = [(ky - 1) * Wp + (kx - 1) for ky in range(3) for kx in range(3)]
    mask = mask_ref[...]                                       # (1, NB*L)

    # ---- conv1: stage 9 shifted windows per image, then ONE MXU matmul ----
    for b in range(NB):
        for t, s in enumerate(shifts):
            win_ref[t * Cp:(t + 1) * Cp, b * L:(b + 1) * L] = \
                x_ref[b, :, OFF + s:OFF + s + L]
    acc1 = jnp.dot(w1_ref[...], win_ref[...],
                   preferred_element_type=jnp.float32)         # (Cp, NB*L)

    # ReLU, then zero the padding ring / lane tail so conv2 sees zero padding.
    out1 = jnp.maximum(acc1, 0.0) * mask

    # Stage the intermediate with an explicitly zeroed halo (robust: conv2
    # never reads stale VMEM, regardless of future stride/dilation variants).
    mid_ref[...] = jnp.zeros_like(mid_ref)
    for b in range(NB):
        mid_ref[:, b * LE + OFF:b * LE + OFF + L] = out1[:, b * L:(b + 1) * L]

    # ---- conv2: same shifted-window staging + ONE MXU matmul ----
    for b in range(NB):
        for t, s in enumerate(shifts):
            win_ref[t * Cp:(t + 1) * Cp, b * L:(b + 1) * L] = \
                mid_ref[:, b * LE + OFF + s:b * LE + OFF + s + L]
    acc2 = jnp.dot(w2_ref[...], win_ref[...],
                   preferred_element_type=jnp.float32)         # (Cp, NB*L)

    # ---- identity residual + relu; lane-dense (Cp, L) stores per image ----
    for b in range(NB):
        resid = x_ref[b, :, OFF:OFF + L]
        out_ref[b] = jnp.maximum(acc2[:, b * L:(b + 1) * L] + resid,
                                 0.0).astype(out_ref.dtype)


def noblock_forward(x_nchw, w1, w2, *, images_per_step=None):
    """NoBlock forward. x: (N, Cin, H, W); w1: (Cm, Cin, 3, 3); w2: (Cm, Cm, 3, 3)."""
    N, Cin, H, W = x_nchw.shape
    Cm = w1.shape[0]
    assert w1.shape == (Cm, Cin, 3, 3) and w2.shape == (Cm, Cm, 3, 3)
    assert Cin == Cm, "identity-shortcut NoBlock requires in_planes == planes"

    Hp, Wp = H + 2, W + 2
    Cp = _round_up(Cm, 8)                 # sublane-aligned channel count
    Lv = Hp * Wp                          # flattened padded spatial extent
    L = _round_up(Lv, 128)                # lane-dense per-image width
    OFF = Wp + 1                          # max |tap shift|
    LE = _round_up(2 * OFF + L, 128)      # per-image halo'd lane extent

    # Batch folding: NB images per grid step (matmul N-dim = NB*L lanes).
    # v5e/v6e (1 TC): 1 grid step; v7x (2 TCs): 2 parallel steps.
    if images_per_step is None:
        n_steps = 2 if (N >= 2 and _tensorcores_per_chip() >= 2) else 1
        NB = min(_cdiv(N, n_steps), 32)   # cap NB to bound VMEM for big batches
    else:
        NB = max(1, int(images_per_step))
    n_steps = _cdiv(N, NB)
    N_pad = n_steps * NB

    f32 = jnp.float32

    # Host glue (tiny at this size): zero-pad channels to Cp and spatial by 1,
    # flatten spatial, add lane halo, pad batch to n_steps*NB.
    x_pad = jnp.pad(x_nchw.astype(f32), ((0, 0), (0, Cp - Cin), (1, 1), (1, 1)))
    x_ext = jnp.pad(x_pad.reshape(N, Cp, Lv),
                    ((0, N_pad - N), (0, 0), (OFF, LE - OFF - Lv)))

    # Weights OIHW -> lane-dense slab (Cp, 9*Cp) with columns [t*Cp + c_in].
    # (f32 kept for the 1e-4 check; use bf16 for large-channel templates.)
    def prep_w(w, ci):
        wt = jnp.transpose(w.astype(f32), (2, 3, 0, 1)).reshape(9, Cm, ci)
        wt = jnp.pad(wt, ((0, 0), (0, Cp - Cm), (0, Cp - ci)))
        return jnp.transpose(wt, (1, 0, 2)).reshape(Cp, 9 * Cp)

    w1_s = prep_w(w1, Cin)
    w2_s = prep_w(w2, Cm)

    # Interior mask over the flattened padded frame, tiled across NB images.
    mask2d = jnp.zeros((Hp, Wp), f32).at[1:H + 1, 1:W + 1].set(1.0)
    mask = jnp.pad(mask2d.reshape(1, Lv), ((0, 0), (0, L - Lv)))
    mask = jnp.tile(mask, (1, NB))

    kernel = functools.partial(_noblock_kernel, NB=NB, Wp=Wp, L=L, OFF=OFF,
                               Cp=Cp, LE=LE)

    out = pl.pallas_call(
        kernel,
        out_shape=jax.ShapeDtypeStruct((N_pad, Cp, L), x_nchw.dtype),
        grid_spec=pltpu.PrefetchScalarGridSpec(
            num_scalar_prefetch=0,
            grid=(n_steps,),
            in_specs=[
                pl.BlockSpec((NB, Cp, LE), lambda n: (n, 0, 0)),    # halo'd x
                pl.BlockSpec((1, NB * L), lambda n: (0, 0)),        # interior mask
                pl.BlockSpec((Cp, 9 * Cp), lambda n: (0, 0)),       # conv1 slab
                pl.BlockSpec((Cp, 9 * Cp), lambda n: (0, 0)),       # conv2 slab
            ],
            out_specs=pl.BlockSpec((NB, Cp, L), lambda n: (n, 0, 0)),
            scratch_shapes=[
                pltpu.VMEM((9 * Cp, NB * L), jnp.float32),   # stacked windows
                pltpu.VMEM((Cp, NB * LE), jnp.float32),      # relu(conv1) + halo
            ],
        ),
        compiler_params=pltpu.CompilerParams(
            dimension_semantics=("parallel",)),
    )(x_ext, mask, w1_s, w2_s)

    # Crop batch pad, padded channels, lane tail and the 1-pixel ring -> NCHW.
    out = out[:N, :Cm, :Lv].reshape(N, Cm, Hp, Wp)[:, :, 1:H + 1, 1:W + 1]
    return out


def _reference(x, w1, w2):
    """Pure-JAX reference matching the PyTorch forward (identity shortcut)."""
    dn = ("NCHW", "OIHW", "NCHW")
    c1 = lax.conv_general_dilated(x, w1, (1, 1), ((1, 1), (1, 1)), dimension_numbers=dn)
    o = jnp.maximum(c1, 0.0)
    c2 = lax.conv_general_dilated(o, w2, (1, 1), ((1, 1), (1, 1)), dimension_numbers=dn)
    return jnp.maximum(c2 + x, 0.0)


if __name__ == "__main__":
    N, C, H, W = 2, 4, 16, 16  # in_planes = planes = 4, stride = 1 -> no shortcut conv
    key = jax.random.PRNGKey(0)
    kx, k1, k2 = jax.random.split(key, 3)

    x = jax.random.normal(kx, (N, C, H, W), dtype=jnp.float32)
    w1 = jax.random.normal(k1, (C, C, 3, 3), dtype=jnp.float32) * 0.1  # conv1 weight (OIHW)
    w2 = jax.random.normal(k2, (C, C, 3, 3), dtype=jnp.float32) * 0.1  # conv2 weight (OIHW)

    out = jax.block_until_ready(noblock_forward(x, w1, w2))

    ref = jax.block_until_ready(_reference(x, w1, w2))
    assert out.shape == (N, C, H, W)
    assert jnp.allclose(out, ref, atol=1e-4, rtol=1e-4), "mismatch vs reference conv"

    print("KERNEL_OK")
</pallas_src>

<mosaic_0001>
module attributes {stable_mosaic.version = 11 : i64} {
  func.func @_noblock_kernel(%arg0: i32, %arg1: memref<2x8x512xf32, #tpu.memory_space<vmem>>, %arg2: memref<1x768xf32, #tpu.memory_space<vmem>>, %arg3: memref<8x72xf32, #tpu.memory_space<vmem>>, %arg4: memref<8x72xf32, #tpu.memory_space<vmem>>, %arg5: memref<2x8x384xf32, #tpu.memory_space<vmem>>, %arg6: memref<72x768xf32, #tpu.memory_space<vmem>>, %arg7: memref<8x1024xf32, #tpu.memory_space<vmem>>) attributes {dimension_semantics = [#tpu.dimension_semantics<parallel>], iteration_bounds = array<i64: 1>, scalar_prefetch = 0 : i64, scratch_operands = 2 : i64, tpu.core_type = #tpu.core_type<tc>, window_params = [{transform_indices = @transform_0, window_bounds = array<i64: 2, 8, 512>}, {pipeline_mode = #tpu.pipeline_mode<synchronous>, transform_indices = @transform_1, window_bounds = array<i64: 1, 768>}, {pipeline_mode = #tpu.pipeline_mode<synchronous>, transform_indices = @transform_2, window_bounds = array<i64: 8, 72>}, {pipeline_mode = #tpu.pipeline_mode<synchronous>, transform_indices = @transform_3, window_bounds = array<i64: 8, 72>}, {transform_indices = @transform_4, window_bounds = array<i64: 2, 8, 384>}]} {
    %c0 = arith.constant 0 : index
    %c0_0 = arith.constant 0 : index
    %0 = vector.load %arg2[%c0, %c0_0] : memref<1x768xf32, #tpu.memory_space<vmem>>, vector<1x768xf32>
    %c0_1 = arith.constant 0 : index
    %c0_2 = arith.constant 0 : index
    %c0_3 = arith.constant 0 : index
    %1 = vector.load %arg1[%c0_1, %c0_2, %c0_3] : memref<2x8x512xf32, #tpu.memory_space<vmem>>, vector<1x8x384xf32>
    %2 = vector.shape_cast %1 : vector<1x8x384xf32> to vector<8x384xf32>
    %c0_4 = arith.constant 0 : index
    %c0_5 = arith.constant 0 : index
    %3 = vector.load %arg6[%c0_4, %c0_5] : memref<72x768xf32, #tpu.memory_space<vmem>>, vector<8x384xf32>
    tpu.vector_store %arg6[%c0_4, %c0_5], %2 {strides = array<i32>} : memref<72x768xf32, #tpu.memory_space<vmem>>, vector<8x384xf32>,
    %c0_6 = arith.constant 0 : index
    %c0_7 = arith.constant 0 : index
    %c1 = arith.constant 1 : index
    %4 = vector.load %arg1[%c0_6, %c0_7, %c1] : memref<2x8x512xf32, #tpu.memory_space<vmem>>, vector<1x8x384xf32>
    %5 = vector.shape_cast %4 : vector<1x8x384xf32> to vector<8x384xf32>
    %c8 = arith.constant 8 : index
    %c0_8 = arith.constant 0 : index
    %6 = vector.load %arg6[%c8, %c0_8] : memref<72x768xf32, #tpu.memory_space<vmem>>, vector<8x384xf32>
    tpu.vector_store %arg6[%c8, %c0_8], %5 {strides = array<i32>} : memref<72x768xf32, #tpu.memory_space<vmem>>, vector<8x384xf32>,
    %c0_9 = arith.constant 0 : index
    %c0_10 = arith.constant 0 : index
    %c2 = arith.constant 2 : index
    %7 = vector.load %arg1[%c0_9, %c0_10, %c2] : memref<2x8x512xf32, #tpu.memory_space<vmem>>, vector<1x8x384xf32>
    %8 = vector.shape_cast %7 : vector<1x8x384xf32> to vector<8x384xf32>
    %c16 = arith.constant 16 : index
    %c0_11 = arith.constant 0 : index
    %9 = vector.load %arg6[%c16, %c0_11] : memref<72x768xf32, #tpu.memory_space<vmem>>, vector<8x384xf32>
    tpu.vector_store %arg6[%c16, %c0_11], %8 {strides = array<i32>} : memref<72x768xf32, #tpu.memory_space<vmem>>, vector<8x384xf32>,
    %c0_12 = arith.constant 0 : index
    %c0_13 = arith.constant 0 : index
    %c18 = arith.constant 18 : index
    %10 = vector.load %arg1[%c0_12, %c0_13, %c18] : memref<2x8x512xf32, #tpu.memory_space<vmem>>, vector<1x8x384xf32>
    %11 = vector.shape_cast %10 : vector<1x8x384xf32> to vector<8x384xf32>
    %c24 = arith.constant 24 : index
    %c0_14 = arith.constant 0 : index
    %12 = vector.load %arg6[%c24, %c0_14] : memref<72x768xf32, #tpu.memory_space<vmem>>, vector<8x384xf32>
    tpu.vector_store %arg6[%c24, %c0_14], %11 {strides = array<i32>} : memref<72x768xf32, #tpu.memory_space<vmem>>, vector<8x384xf32>,
    %c0_15 = arith.constant 0 : index
    %c0_16 = arith.constant 0 : index
    %c19 = arith.constant 19 : index
    %13 = vector.load %arg1[%c0_15, %c0_16, %c19] : memref<2x8x512xf32, #tpu.memory_space<vmem>>, vector<1x8x384xf32>
    %14 = vector.shape_cast %13 : vector<1x8x384xf32> to vector<8x384xf32>
    %c32 = arith.constant 32 : index
    %c0_17 = arith.constant 0 : index
    %15 = vector.load %arg6[%c32, %c0_17] : memref<72x768xf32, #tpu.memory_space<vmem>>, vector<8x384xf32>
    tpu.vector_store %arg6[%c32, %c0_17], %14 {strides = array<i32>} : memref<72x768xf32, #tpu.memory_space<vmem>>, vector<8x384xf32>,
    %c0_18 = arith.constant 0 : index
    %c0_19 = arith.constant 0 : index
    %c20 = arith.constant 20 : index
    %16 = vector.load %arg1[%c0_18, %c0_19, %c20] : memref<2x8x512xf32, #tpu.memory_space<vmem>>, vector<1x8x384xf32>
    %17 = vector.shape_cast %16 : vector<1x8x384xf32> to vector<8x384xf32>
    %c40 = arith.constant 40 : index
    %c0_20 = arith.constant 0 : index
    %18 = vector.load %arg6[%c40, %c0_20] : memref<72x768xf32, #tpu.memory_space<vmem>>, vector<8x384xf32>
    tpu.vector_store %arg6[%c40, %c0_20], %17 {strides = array<i32>} : memref<72x768xf32, #tpu.memory_space<vmem>>, vector<8x384xf32>,
    %c0_21 = arith.constant 0 : index
    %c0_22 = arith.constant 0 : index
    %c36 = arith.constant 36 : index
    %19 = vector.load %arg1[%c0_21, %c0_22, %c36] : memref<2x8x512xf32, #tpu.memory_space<vmem>>, vector<1x8x384xf32>
    %20 = vector.shape_cast %19 : vector<1x8x384xf32> to vector<8x384xf32>
    %c48 = arith.constant 48 : index
    %c0_23 = arith.constant 0 : index
    %21 = vector.load %arg6[%c48, %c0_23] : memref<72x768xf32, #tpu.memory_space<vmem>>, vector<8x384xf32>
    tpu.vector_store %arg6[%c48, %c0_23], %20 {strides = array<i32>} : memref<72x768xf32, #tpu.memory_space<vmem>>, vector<8x384xf32>,
    %c0_24 = arith.constant 0 : index
    %c0_25 = arith.constant 0 : index
    %c37 = arith.constant 37 : index
    %22 = vector.load %arg1[%c0_24, %c0_25, %c37] : memref<2x8x512xf32, #tpu.memory_space<vmem>>, vector<1x8x384xf32>
    %23 = vector.shape_cast %22 : vector<1x8x384xf32> to vector<8x384xf32>
    %c56 = arith.constant 56 : index
    %c0_26 = arith.constant 0 : index
    %24 = vector.load %arg6[%c56, %c0_26] : memref<72x768xf32, #tpu.memory_space<vmem>>, vector<8x384xf32>
    tpu.vector_store %arg6[%c56, %c0_26], %23 {strides = array<i32>} : memref<72x768xf32, #tpu.memory_space<vmem>>, vector<8x384xf32>,
    %c0_27 = arith.constant 0 : index
    %c0_28 = arith.constant 0 : index
    %c38 = arith.constant 38 : index
    %25 = vector.load %arg1[%c0_27, %c0_28, %c38] : memref<2x8x512xf32, #tpu.memory_space<vmem>>, vector<1x8x384xf32>
    %26 = vector.shape_cast %25 : vector<1x8x384xf32> to vector<8x384xf32>
    %c64 = arith.constant 64 : index
    %c0_29 = arith.constant 0 : index
    %27 = vector.load %arg6[%c64, %c0_29] : memref<72x768xf32, #tpu.memory_space<vmem>>, vector<8x384xf32>
    tpu.vector_store %arg6[%c64, %c0_29], %26 {strides = array<i32>} : memref<72x768xf32, #tpu.memory_space<vmem>>, vector<8x384xf32>,
    %c1_30 = arith.constant 1 : index
    %c0_31 = arith.constant 0 : index
    %c0_32 = arith.constant 0 : index
    %28 = vector.load %arg1[%c1_30, %c0_31, %c0_32] : memref<2x8x512xf32, #tpu.memory_space<vmem>>, vector<1x8x384xf32>
    %29 = vector.shape_cast %28 : vector<1x8x384xf32> to vector<8x384xf32>
    %c0_33 = arith.constant 0 : index
    %c384 = arith.constant 384 : index
    %30 = vector.load %arg6[%c0_33, %c384] : memref<72x768xf32, #tpu.memory_space<vmem>>, vector<8x384xf32>
    tpu.vector_store %arg6[%c0_33, %c384], %29 {strides = array<i32>} : memref<72x768xf32, #tpu.memory_space<vmem>>, vector<8x384xf32>,
    %c1_34 = arith.constant 1 : index
    %c0_35 = arith.constant 0 : index
    %c1_36 = arith.constant 1 : index
    %31 = vector.load %arg1[%c1_34, %c0_35, %c1_36] : memref<2x8x512xf32, #tpu.memory_space<vmem>>, vector<1x8x384xf32>
    %32 = vector.shape_cast %31 : vector<1x8x384xf32> to vector<8x384xf32>
    %c8_37 = arith.constant 8 : index
    %c384_38 = arith.constant 384 : index
    %33 = vector.load %arg6[%c8_37, %c384_38] : memref<72x768xf32, #tpu.memory_space<vmem>>, vector<8x384xf32>
    tpu.vector_store %arg6[%c8_37, %c384_38], %32 {strides = array<i32>} : memref<72x768xf32, #tpu.memory_space<vmem>>, vector<8x384xf32>,
    %c1_39 = arith.constant 1 : index
    %c0_40 = arith.constant 0 : index
    %c2_41 = arith.constant 2 : index
    %34 = vector.load %arg1[%c1_39, %c0_40, %c2_41] : memref<2x8x512xf32, #tpu.memory_space<vmem>>, vector<1x8x384xf32>
    %35 = vector.shape_cast %34 : vector<1x8x384xf32> to vector<8x384xf32>
    %c16_42 = arith.constant 16 : index
    %c384_43 = arith.constant 384 : index
    %36 = vector.load %arg6[%c16_42, %c384_43] : memref<72x768xf32, #tpu.memory_space<vmem>>, vector<8x384xf32>
    tpu.vector_store %arg6[%c16_42, %c384_43], %35 {strides = array<i32>} : memref<72x768xf32, #tpu.memory_space<vmem>>, vector<8x384xf32>,
    %c1_44 = arith.constant 1 : index
    %c0_45 = arith.constant 0 : index
    %c18_46 = arith.constant 18 : index
    %37 = vector.load %arg1[%c1_44, %c0_45, %c18_46] : memref<2x8x512xf32, #tpu.memory_space<vmem>>, vector<1x8x384xf32>
    %38 = vector.shape_cast %37 : vector<1x8x384xf32> to vector<8x384xf32>
    %c24_47 = arith.constant 24 : index
    %c384_48 = arith.constant 384 : index
    %39 = vector.load %arg6[%c24_47, %c384_48] : memref<72x768xf32, #tpu.memory_space<vmem>>, vector<8x384xf32>
    tpu.vector_store %arg6[%c24_47, %c384_48], %38 {strides = array<i32>} : memref<72x768xf32, #tpu.memory_space<vmem>>, vector<8x384xf32>,
    %c1_49 = arith.constant 1 : index
    %c0_50 = arith.constant 0 : index
    %c19_51 = arith.constant 19 : index
    %40 = vector.load %arg1[%c1_49, %c0_50, %c19_51] : memref<2x8x512xf32, #tpu.memory_space<vmem>>, vector<1x8x384xf32>
    %41 = vector.shape_cast %40 : vector<1x8x384xf32> to vector<8x384xf32>
    %c32_52 = arith.constant 32 : index
    %c384_53 = arith.constant 384 : index
    %42 = vector.load %arg6[%c32_52, %c384_53] : memref<72x768xf32, #tpu.memory_space<vmem>>, vector<8x384xf32>
    tpu.vector_store %arg6[%c32_52, %c384_53], %41 {strides = array<i32>} : memref<72x768xf32, #tpu.memory_space<vmem>>, vector<8x384xf32>,
    %c1_54 = arith.constant 1 : index
    %c0_55 = arith.constant 0 : index
    %c20_56 = arith.constant 20 : index
    %43 = vector.load %arg1[%c1_54, %c0_55, %c20_56] : memref<2x8x512xf32, #tpu.memory_space<vmem>>, vector<1x8x384xf32>
    %44 = vector.shape_cast %43 : vector<1x8x384xf32> to vector<8x384xf32>
    %c40_57 = arith.constant 40 : index
    %c384_58 = arith.constant 384 : index
    %45 = vector.load %arg6[%c40_57, %c384_58] : memref<72x768xf32, #tpu.memory_space<vmem>>, vector<8x384xf32>
    tpu.vector_store %arg6[%c40_57, %c384_58], %44 {strides = array<i32>} : memref<72x768xf32, #tpu.memory_space<vmem>>, vector<8x384xf32>,
    %c1_59 = arith.constant 1 : index
    %c0_60 = arith.constant 0 : index
    %c36_61 = arith.constant 36 : index
    %46 = vector.load %arg1[%c1_59, %c0_60, %c36_61] : memref<2x8x512xf32, #tpu.memory_space<vmem>>, vector<1x8x384xf32>
    %47 = vector.shape_cast %46 : vector<1x8x384xf32> to vector<8x384xf32>
    %c48_62 = arith.constant 48 : index
    %c384_63 = arith.constant 384 : index
    %48 = vector.load %arg6[%c48_62, %c384_63] : memref<72x768xf32, #tpu.memory_space<vmem>>, vector<8x384xf32>
    tpu.vector_store %arg6[%c48_62, %c384_63], %47 {strides = array<i32>} : memref<72x768xf32, #tpu.memory_space<vmem>>, vector<8x384xf32>,
    %c1_64 = arith.constant 1 : index
    %c0_65 = arith.constant 0 : index
    %c37_66 = arith.constant 37 : index
    %49 = vector.load %arg1[%c1_64, %c0_65, %c37_66] : memref<2x8x512xf32, #tpu.memory_space<vmem>>, vector<1x8x384xf32>
    %50 = vector.shape_cast %49 : vector<1x8x384xf32> to vector<8x384xf32>
    %c56_67 = arith.constant 56 : index
    %c384_68 = arith.constant 384 : index
    %51 = vector.load %arg6[%c56_67, %c384_68] : memref<72x768xf32, #tpu.memory_space<vmem>>, vector<8x384xf32>
    tpu.vector_store %arg6[%c56_67, %c384_68], %50 {strides = array<i32>} : memref<72x768xf32, #tpu.memory_space<vmem>>, vector<8x384xf32>,
    %c1_69 = arith.constant 1 : index
    %c0_70 = arith.constant 0 : index
    %c38_71 = arith.constant 38 : index
    %52 = vector.load %arg1[%c1_69, %c0_70, %c38_71] : memref<2x8x512xf32, #tpu.memory_space<vmem>>, vector<1x8x384xf32>
    %53 = vector.shape_cast %52 : vector<1x8x384xf32> to vector<8x384xf32>
    %c64_72 = arith.constant 64 : index
    %c384_73 = arith.constant 384 : index
    %54 = vector.load %arg6[%c64_72, %c384_73] : memref<72x768xf32, #tpu.memory_space<vmem>>, vector<8x384xf32>
    tpu.vector_store %arg6[%c64_72, %c384_73], %53 {strides = array<i32>} : memref<72x768xf32, #tpu.memory_space<vmem>>, vector<8x384xf32>,
    %c0_74 = arith.constant 0 : index
    %c0_75 = arith.constant 0 : index
    %55 = vector.load %arg3[%c0_74, %c0_75] : memref<8x72xf32, #tpu.memory_space<vmem>>, vector<8x72xf32>
    %c0_76 = arith.constant 0 : index
    %c0_77 = arith.constant 0 : index
    %56 = vector.load %arg6[%c0_76, %c0_77] : memref<72x768xf32, #tpu.memory_space<vmem>>, vector<72x768xf32>
    %cst = arith.constant dense<0.000000e+00> : vector<8x768xf32>
    %57 = tpu.matmul %55, %56, %cst {dimension_numbers = #tpu.dot_dimension_numbers<[1], [0], [0], [1], [0, 0, 1, 1], [], []>} : vector<8x72xf32>, vector<72x768xf32>, vector<8x768xf32> -> vector<8x768xf32>
    %cst_78 = arith.constant 0.000000e+00 : f32
    %58 = vector.broadcast %cst_78 : f32 to vector<8x768xf32>
    %59 = arith.maximumf %57, %58 : vector<8x768xf32>
    %60 = vector.broadcast %0 : vector<1x768xf32> to vector<8x768xf32>
    %61 = arith.mulf %59, %60 : vector<8x768xf32>
    %cst_79 = arith.constant 0.000000e+00 : f32
    %62 = vector.broadcast %cst_79 : f32 to vector<8x1024xf32>
    %c0_80 = arith.constant 0 : index
    %c0_81 = arith.constant 0 : index
    %63 = vector.load %arg7[%c0_80, %c0_81] : memref<8x1024xf32, #tpu.memory_space<vmem>>, vector<8x1024xf32>
    tpu.vector_store %arg7[%c0_80, %c0_81], %62 {strides = array<i32>} : memref<8x1024xf32, #tpu.memory_space<vmem>>, vector<8x1024xf32>,
    %64 = vector.extract_strided_slice %61 {offsets = [0, 0], sizes = [8, 384], strides = [1, 1]} : vector<8x768xf32> to vector<8x384xf32>
    %c0_82 = arith.constant 0 : index
    %c19_83 = arith.constant 19 : index
    %65 = vector.load %arg7[%c0_82, %c19_83] : memref<8x1024xf32, #tpu.memory_space<vmem>>, vector<8x384xf32>
    tpu.vector_store %arg7[%c0_82, %c19_83], %64 {strides = array<i32>} : memref<8x1024xf32, #tpu.memory_space<vmem>>, vector<8x384xf32>,
    %66 = vector.extract_strided_slice %61 {offsets = [0, 384], sizes = [8, 384], strides = [1, 1]} : vector<8x768xf32> to vector<8x384xf32>
    %c0_84 = arith.constant 0 : index
    %c531 = arith.constant 531 : index
    %67 = vector.load %arg7[%c0_84, %c531] : memref<8x1024xf32, #tpu.memory_space<vmem>>, vector<8x384xf32>
    tpu.vector_store %arg7[%c0_84, %c531], %66 {strides = array<i32>} : memref<8x1024xf32, #tpu.memory_space<vmem>>, vector<8x384xf32>,
    %c0_85 = arith.constant 0 : index
    %c0_86 = arith.constant 0 : index
    %68 = vector.load %arg7[%c0_85, %c0_86] : memref<8x1024xf32, #tpu.memory_space<vmem>>, vector<8x384xf32>
    %c0_87 = arith.constant 0 : index
    %c0_88 = arith.constant 0 : index
    %69 = vector.load %arg6[%c0_87, %c0_88] : memref<72x768xf32, #tpu.memory_space<vmem>>, vector<8x384xf32>
    tpu.vector_store %arg6[%c0_87, %c0_88], %68 {strides = array<i32>} : memref<72x768xf32, #tpu.memory_space<vmem>>, vector<8x384xf32>,
    %c0_89 = arith.constant 0 : index
    %c1_90 = arith.constant 1 : index
    %70 = vector.load %arg7[%c0_89, %c1_90] : memref<8x1024xf32, #tpu.memory_space<vmem>>, vector<8x384xf32>
    %c8_91 = arith.constant 8 : index
    %c0_92 = arith.constant 0 : index
    %71 = vector.load %arg6[%c8_91, %c0_92] : memref<72x768xf32, #tpu.memory_space<vmem>>, vector<8x384xf32>
    tpu.vector_store %arg6[%c8_91, %c0_92], %70 {strides = array<i32>} : memref<72x768xf32, #tpu.memory_space<vmem>>, vector<8x384xf32>,
    %c0_93 = arith.constant 0 : index
    %c2_94 = arith.constant 2 : index
    %72 = vector.load %arg7[%c0_93, %c2_94] : memref<8x1024xf32, #tpu.memory_space<vmem>>, vector<8x384xf32>
    %c16_95 = arith.constant 16 : index
    %c0_96 = arith.constant 0 : index
    %73 = vector.load %arg6[%c16_95, %c0_96] : memref<72x768xf32, #tpu.memory_space<vmem>>, vector<8x384xf32>
    tpu.vector_store %arg6[%c16_95, %c0_96], %72 {strides = array<i32>} : memref<72x768xf32, #tpu.memory_space<vmem>>, vector<8x384xf32>,
    %c0_97 = arith.constant 0 : index
    %c18_98 = arith.constant 18 : index
    %74 = vector.load %arg7[%c0_97, %c18_98] : memref<8x1024xf32, #tpu.memory_space<vmem>>, vector<8x384xf32>
    %c24_99 = arith.constant 24 : index
    %c0_100 = arith.constant 0 : index
    %75 = vector.load %arg6[%c24_99, %c0_100] : memref<72x768xf32, #tpu.memory_space<vmem>>, vector<8x384xf32>
    tpu.vector_store %arg6[%c24_99, %c0_100], %74 {strides = array<i32>} : memref<72x768xf32, #tpu.memory_space<vmem>>, vector<8x384xf32>,
    %c0_101 = arith.constant 0 : index
    %c19_102 = arith.constant 19 : index
    %76 = vector.load %arg7[%c0_101, %c19_102] : memref<8x1024xf32, #tpu.memory_space<vmem>>, vector<8x384xf32>
    %c32_103 = arith.constant 32 : index
    %c0_104 = arith.constant 0 : index
    %77 = vector.load %arg6[%c32_103, %c0_104] : memref<72x768xf32, #tpu.memory_space<vmem>>, vector<8x384xf32>
    tpu.vector_store %arg6[%c32_103, %c0_104], %76 {strides = array<i32>} : memref<72x768xf32, #tpu.memory_space<vmem>>, vector<8x384xf32>,
    %c0_105 = arith.constant 0 : index
    %c20_106 = arith.constant 20 : index
    %78 = vector.load %arg7[%c0_105, %c20_106] : memref<8x1024xf32, #tpu.memory_space<vmem>>, vector<8x384xf32>
    %c40_107 = arith.constant 40 : index
    %c0_108 = arith.constant 0 : index
    %79 = vector.load %arg6[%c40_107, %c0_108] : memref<72x768xf32, #tpu.memory_space<vmem>>, vector<8x384xf32>
    tpu.vector_store %arg6[%c40_107, %c0_108], %78 {strides = array<i32>} : memref<72x768xf32, #tpu.memory_space<vmem>>, vector<8x384xf32>,
    %c0_109 = arith.constant 0 : index
    %c36_110 = arith.constant 36 : index
    %80 = vector.load %arg7[%c0_109, %c36_110] : memref<8x1024xf32, #tpu.memory_space<vmem>>, vector<8x384xf32>
    %c48_111 = arith.constant 48 : index
    %c0_112 = arith.constant 0 : index
    %81 = vector.load %arg6[%c48_111, %c0_112] : memref<72x768xf32, #tpu.memory_space<vmem>>, vector<8x384xf32>
    tpu.vector_store %arg6[%c48_111, %c0_112], %80 {strides = array<i32>} : memref<72x768xf32, #tpu.memory_space<vmem>>, vector<8x384xf32>,
    %c0_113 = arith.constant 0 : index
    %c37_114 = arith.constant 37 : index
    %82 = vector.load %arg7[%c0_113, %c37_114] : memref<8x1024xf32, #tpu.memory_space<vmem>>, vector<8x384xf32>
    %c56_115 = arith.constant 56 : index
    %c0_116 = arith.constant 0 : index
    %83 = vector.load %arg6[%c56_115, %c0_116] : memref<72x768xf32, #tpu.memory_space<vmem>>, vector<8x384xf32>
    tpu.vector_store %arg6[%c56_115, %c0_116], %82 {strides = array<i32>} : memref<72x768xf32, #tpu.memory_space<vmem>>, vector<8x384xf32>,
    %c0_117 = arith.constant 0 : index
    %c38_118 = arith.constant 38 : index
    %84 = vector.load %arg7[%c0_117, %c38_118] : memref<8x1024xf32, #tpu.memory_space<vmem>>, vector<8x384xf32>
    %c64_119 = arith.constant 64 : index
    %c0_120 = arith.constant 0 : index
    %85 = vector.load %arg6[%c64_119, %c0_120] : memref<72x768xf32, #tpu.memory_space<vmem>>, vector<8x384xf32>
    tpu.vector_store %arg6[%c64_119, %c0_120], %84 {strides = array<i32>} : memref<72x768xf32, #tpu.memory_space<vmem>>, vector<8x384xf32>,
    %c0_121 = arith.constant 0 : index
    %c512 = arith.constant 512 : index
    %86 = vector.load %arg7[%c0_121, %c512] : memref<8x1024xf32, #tpu.memory_space<vmem>>, vector<8x384xf32>
    %c0_122 = arith.constant 0 : index
    %c384_123 = arith.constant 384 : index
    %87 = vector.load %arg6[%c0_122, %c384_123] : memref<72x768xf32, #tpu.memory_space<vmem>>, vector<8x384xf32>
    tpu.vector_store %arg6[%c0_122, %c384_123], %86 {strides = array<i32>} : memref<72x768xf32, #tpu.memory_space<vmem>>, vector<8x384xf32>,
    %c0_124 = arith.constant 0 : index
    %c513 = arith.constant 513 : index
    %88 = vector.load %arg7[%c0_124, %c513] : memref<8x1024xf32, #tpu.memory_space<vmem>>, vector<8x384xf32>
    %c8_125 = arith.constant 8 : index
    %c384_126 = arith.constant 384 : index
    %89 = vector.load %arg6[%c8_125, %c384_126] : memref<72x768xf32, #tpu.memory_space<vmem>>, vector<8x384xf32>
    tpu.vector_store %arg6[%c8_125, %c384_126], %88 {strides = array<i32>} : memref<72x768xf32, #tpu.memory_space<vmem>>, vector<8x384xf32>,
    %c0_127 = arith.constant 0 : index
    %c514 = arith.constant 514 : index
    %90 = vector.load %arg7[%c0_127, %c514] : memref<8x1024xf32, #tpu.memory_space<vmem>>, vector<8x384xf32>
    %c16_128 = arith.constant 16 : index
    %c384_129 = arith.constant 384 : index
    %91 = vector.load %arg6[%c16_128, %c384_129] : memref<72x768xf32, #tpu.memory_space<vmem>>, vector<8x384xf32>
    tpu.vector_store %arg6[%c16_128, %c384_129], %90 {strides = array<i32>} : memref<72x768xf32, #tpu.memory_space<vmem>>, vector<8x384xf32>,
    %c0_130 = arith.constant 0 : index
    %c530 = arith.constant 530 : index
    %92 = vector.load %arg7[%c0_130, %c530] : memref<8x1024xf32, #tpu.memory_space<vmem>>, vector<8x384xf32>
    %c24_131 = arith.constant 24 : index
    %c384_132 = arith.constant 384 : index
    %93 = vector.load %arg6[%c24_131, %c384_132] : memref<72x768xf32, #tpu.memory_space<vmem>>, vector<8x384xf32>
    tpu.vector_store %arg6[%c24_131, %c384_132], %92 {strides = array<i32>} : memref<72x768xf32, #tpu.memory_space<vmem>>, vector<8x384xf32>,
    %c0_133 = arith.constant 0 : index
    %c531_134 = arith.constant 531 : index
    %94 = vector.load %arg7[%c0_133, %c531_134] : memref<8x1024xf32, #tpu.memory_space<vmem>>, vector<8x384xf32>
    %c32_135 = arith.constant 32 : index
    %c384_136 = arith.constant 384 : index
    %95 = vector.load %arg6[%c32_135, %c384_136] : memref<72x768xf32, #tpu.memory_space<vmem>>, vector<8x384xf32>
    tpu.vector_store %arg6[%c32_135, %c384_136], %94 {strides = array<i32>} : memref<72x768xf32, #tpu.memory_space<vmem>>, vector<8x384xf32>,
    %c0_137 = arith.constant 0 : index
    %c532 = arith.constant 532 : index
    %96 = vector.load %arg7[%c0_137, %c532] : memref<8x1024xf32, #tpu.memory_space<vmem>>, vector<8x384xf32>
    %c40_138 = arith.constant 40 : index
    %c384_139 = arith.constant 384 : index
    %97 = vector.load %arg6[%c40_138, %c384_139] : memref<72x768xf32, #tpu.memory_space<vmem>>, vector<8x384xf32>
    tpu.vector_store %arg6[%c40_138, %c384_139], %96 {strides = array<i32>} : memref<72x768xf32, #tpu.memory_space<vmem>>, vector<8x384xf32>,
    %c0_140 = arith.constant 0 : index
    %c548 = arith.constant 548 : index
    %98 = vector.load %arg7[%c0_140, %c548] : memref<8x1024xf32, #tpu.memory_space<vmem>>, vector<8x384xf32>
    %c48_141 = arith.constant 48 : index
    %c384_142 = arith.constant 384 : index
    %99 = vector.load %arg6[%c48_141, %c384_142] : memref<72x768xf32, #tpu.memory_space<vmem>>, vector<8x384xf32>
    tpu.vector_store %arg6[%c48_141, %c384_142], %98 {strides = array<i32>} : memref<72x768xf32, #tpu.memory_space<vmem>>, vector<8x384xf32>,
    %c0_143 = arith.constant 0 : index
    %c549 = arith.constant 549 : index
    %100 = vector.load %arg7[%c0_143, %c549] : memref<8x1024xf32, #tpu.memory_space<vmem>>, vector<8x384xf32>
    %c56_144 = arith.constant 56 : index
    %c384_145 = arith.constant 384 : index
    %101 = vector.load %arg6[%c56_144, %c384_145] : memref<72x768xf32, #tpu.memory_space<vmem>>, vector<8x384xf32>
    tpu.vector_store %arg6[%c56_144, %c384_145], %100 {strides = array<i32>} : memref<72x768xf32, #tpu.memory_space<vmem>>, vector<8x384xf32>,
    %c0_146 = arith.constant 0 : index
    %c550 = arith.constant 550 : index
    %102 = vector.load %arg7[%c0_146, %c550] : memref<8x1024xf32, #tpu.memory_space<vmem>>, vector<8x384xf32>
    %c64_147 = arith.constant 64 : index
    %c384_148 = arith.constant 384 : index
    %103 = vector.load %arg6[%c64_147, %c384_148] : memref<72x768xf32, #tpu.memory_space<vmem>>, vector<8x384xf32>
    tpu.vector_store %arg6[%c64_147, %c384_148], %102 {strides = array<i32>} : memref<72x768xf32, #tpu.memory_space<vmem>>, vector<8x384xf32>,
    %c0_149 = arith.constant 0 : index
    %c0_150 = arith.constant 0 : index
    %104 = vector.load %arg4[%c0_149, %c0_150] : memref<8x72xf32, #tpu.memory_space<vmem>>, vector<8x72xf32>
    %c0_151 = arith.constant 0 : index
    %c0_152 = arith.constant 0 : index
    %105 = vector.load %arg6[%c0_151, %c0_152] : memref<72x768xf32, #tpu.memory_space<vmem>>, vector<72x768xf32>
    %cst_153 = arith.constant dense<0.000000e+00> : vector<8x768xf32>
    %106 = tpu.matmul %104, %105, %cst_153 {dimension_numbers = #tpu.dot_dimension_numbers<[1], [0], [0], [1], [0, 0, 1, 1], [], []>} : vector<8x72xf32>, vector<72x768xf32>, vector<8x768xf32> -> vector<8x768xf32>
    %c0_154 = arith.constant 0 : index
    %c0_155 = arith.constant 0 : index
    %c19_156 = arith.constant 19 : index
    %107 = vector.load %arg1[%c0_154, %c0_155, %c19_156] : memref<2x8x512xf32, #tpu.memory_space<vmem>>, vector<1x8x384xf32>
    %108 = vector.shape_cast %107 : vector<1x8x384xf32> to vector<8x384xf32>
    %109 = vector.extract_strided_slice %106 {offsets = [0, 0], sizes = [8, 384], strides = [1, 1]} : vector<8x768xf32> to vector<8x384xf32>
    %110 = arith.addf %109, %108 : vector<8x384xf32>
    %cst_157 = arith.constant 0.000000e+00 : f32
    %111 = vector.broadcast %cst_157 : f32 to vector<8x384xf32>
    %112 = arith.maximumf %110, %111 : vector<8x384xf32>
    %c0_158 = arith.constant 0 : index
    %c0_159 = arith.constant 0 : index
    %c0_160 = arith.constant 0 : index
    %113 = vector.load %arg5[%c0_158, %c0_159, %c0_160] : memref<2x8x384xf32, #tpu.memory_space<vmem>>, vector<1x8x384xf32>
    %114 = vector.shape_cast %113 : vector<1x8x384xf32> to vector<8x384xf32>
    %115 = vector.shape_cast %112 : vector<8x384xf32> to vector<1x8x384xf32>
    tpu.vector_store %arg5[%c0_158, %c0_159, %c0_160], %115 {strides = array<i32>} : memref<2x8x384xf32, #tpu.memory_space<vmem>>, vector<1x8x384xf32>,
    %c1_161 = arith.constant 1 : index
    %c0_162 = arith.constant 0 : index
    %c19_163 = arith.constant 19 : index
    %116 = vector.load %arg1[%c1_161, %c0_162, %c19_163] : memref<2x8x512xf32, #tpu.memory_space<vmem>>, vector<1x8x384xf32>
    %117 = vector.shape_cast %116 : vector<1x8x384xf32> to vector<8x384xf32>
    %118 = vector.extract_strided_slice %106 {offsets = [0, 384], sizes = [8, 384], strides = [1, 1]} : vector<8x768xf32> to vector<8x384xf32>
    %119 = arith.addf %118, %117 : vector<8x384xf32>
    %cst_164 = arith.constant 0.000000e+00 : f32
    %120 = vector.broadcast %cst_164 : f32 to vector<8x384xf32>
    %121 = arith.maximumf %119, %120 : vector<8x384xf32>
    %c1_165 = arith.constant 1 : index
    %c0_166 = arith.constant 0 : index
    %c0_167 = arith.constant 0 : index
    %122 = vector.load %arg5[%c1_165, %c0_166, %c0_167] : memref<2x8x384xf32, #tpu.memory_space<vmem>>, vector<1x8x384xf32>
    %123 = vector.shape_cast %122 : vector<1x8x384xf32> to vector<8x384xf32>
    %124 = vector.shape_cast %121 : vector<8x384xf32> to vector<1x8x384xf32>
    tpu.vector_store %arg5[%c1_165, %c0_166, %c0_167], %124 {strides = array<i32>} : memref<2x8x384xf32, #tpu.memory_space<vmem>>, vector<1x8x384xf32>,
    return
  }
  func.func @transform_0(%arg0: i32) -> (i32, i32, i32) {
    %c0_i32 = arith.constant 0 : i32
    %c0_i32_0 = arith.constant 0 : i32
    %c0_i32_1 = arith.constant 0 : i32
    return %arg0, %c0_i32, %c0_i32_0 : i32, i32, i32
  }
  func.func @transform_1(%arg0: i32) -> (i32, i32) {
    %c0_i32 = arith.constant 0 : i32
    %c0_i32_0 = arith.constant 0 : i32
    %c0_i32_1 = arith.constant 0 : i32
    return %c0_i32, %c0_i32_0 : i32, i32
  }
  func.func @transform_2(%arg0: i32) -> (i32, i32) {
    %c0_i32 = arith.constant 0 : i32
    %c0_i32_0 = arith.constant 0 : i32
    %c0_i32_1 = arith.constant 0 : i32
    return %c0_i32, %c0_i32_0 : i32, i32
  }
  func.func @transform_3(%arg0: i32) -> (i32, i32) {
    %c0_i32 = arith.constant 0 : i32
    %c0_i32_0 = arith.constant 0 : i32
    %c0_i32_1 = arith.constant 0 : i32
    return %c0_i32, %c0_i32_0 : i32, i32
  }
  func.func @transform_4(%arg0: i32) -> (i32, i32, i32) {
    %c0_i32 = arith.constant 0 : i32
    %c0_i32_0 = arith.constant 0 : i32
    %c0_i32_1 = arith.constant 0 : i32
    return %arg0, %c0_i32, %c0_i32_0 : i32, i32, i32
  }
}

</mosaic_0001>

<bundles_post_ra>
// kernel: tpu_custom_call.1
= control target key start
LH: loop header
LB: loop body
LE: loop exit
PB: predicated region body
PF: predicated region fallthrough
CT: control target
= control target key end

     0   :  { %9 = vsyncpa [#allocation5], 0  ;;  %s2458_s0 = inlined_call_operand.hbm [shape: f32[2,8,512], index: 0, kind: input, shape index: {}]   ;;  %s2459_s1 = inlined_call_operand.hbm [shape: f32[1,768], index: 1, kind: input, shape index: {}]   ;;  %s2460_s2 = inlined_call_operand.hbm [shape: f32[8,72], index: 2, kind: input, shape index: {}]   ;;  %s2461_s3 = inlined_call_operand.hbm [shape: f32[8,72], index: 3, kind: input, shape index: {}]   ;;  %s2462_s4 = inlined_call_operand.hbm [shape: f32[2,8,384], index: 4, kind: output, shape index: {}]  }
   0x1   :  { %10 = vsyncpa [#allocation8], 0 }
   0x2   :  { %11 = vsyncpa [#allocation11], 0  ;;  %s31_s17 = sshll.u32 %s2459_s1, 4  ;;  %s32_s17 = int_to_ptr.hbm [resolvable:$true] %s31_s17 }
   0x3   :  { %12 = vsyncpa [#allocation6], 0  ;;  %s1897_s18 = smov [#allocation7]   ;;  %s17_s22 = sshll.u32 %s2458_s0, 4  ;;  %s18_s22 = int_to_ptr.hbm [resolvable:$true] %s17_s22 }
   0x4   :  { %s33_s19 = sshll.u32 %s1897_s18, 4  ;;  %s1898_s23 = smov [#allocation4]   ;;  %s34_s19 = int_to_ptr.vmem [resolvable:$true] %s33_s19 }
   0x5   :  { %36 = dma.hbm_to_vmem [thread:$0]  %s32_s17, 96, %s34_s19, [#allocation8]  }
   0x6   :  { %s19_s24 = sshll.u32 %s1898_s23, 4  ;;  %s1899_s25 = smov 512   ;;  %s20_s24 = int_to_ptr.vmem [resolvable:$true] %s19_s24 }
   0x7   :  { %s1900_s26 = smov 32   ;;  %s42_s1 = sshll.u32 %s2460_s2, 4  ;;  %s43_s1 = int_to_ptr.hbm [resolvable:$true] %s42_s1 }
   0x8   :  { %25 = dma.hbm_to_vmem [thread:$0]  %s18_s22, 1024, %s20_s24, [#allocation5], %s1899_s25, %s1899_s25, %s1900_s26  }
   0x9   :  { %s1901_s29 = smov [#allocation9]   ;;  %s53_s0 = sshll.u32 %s2461_s3, 4  ;;  %s54_s0 = int_to_ptr.hbm [resolvable:$true] %s53_s0 }
   0xa   :  { %s44_s30 = sshll.u32 %s1901_s29, 4  ;;  %s1902_s7 = smov [#allocation10]   ;;  %s45_s30 = int_to_ptr.vmem [resolvable:$true] %s44_s30 }
   0xb   :  { %47 = dma.hbm_to_vmem [thread:$0]  %s43_s1, 128, %s45_s30, [#allocation8]  }
   0xc   :  { %s55_s8 = sshll.u32 %s1902_s7, 4  ;;  %s56_s8 = int_to_ptr.vmem [resolvable:$true] %s55_s8 }
   0xd   :  { %58 = dma.hbm_to_vmem [thread:$0]  %s54_s0, 128, %s56_s8, [#allocation11]  }
   0xe   :  { %1889 = dma.done.wait [#allocation5], 1024  }
   0xf   :  { %1890 = vsyncadd [#allocation5], 4294966272 }
  0x10   :  { %1891 = dma.done.wait [#allocation8], 224  }
  0x11   :  { %1892 = vsyncadd [#allocation8], 4294967072 }
  0x12   :  { %1893 = dma.done.wait [#allocation11], 128  }
  0x13   :  { %1894 = vsyncadd [#allocation11], 4294967168  ;;  %v1953_v0 = vld [vmem:[#allocation4 + $0x10] sm:$0xff]  ;;  %v267_v1 = vld [vmem:[#allocation4 + $0x18] sm:$0xff]  ;;  %s1903_s2 = smov 90   ;;  %s1904_s3 = smov 92  }
  0x14   :  { %v1955_v2 = vld [vmem:[#allocation4] sm:$0xff]  ;;  %v1454_v3 = vpack.i.bf16 %v267_v1, %v1953_v0  ;;  %v1958_v4 = vld [vmem:[#allocation4 + $0x8] sm:$0xff]  ;;  %s1905_s9 = smov 91   ;;  %s1906_s10 = smov 108   ;;  %v1983_v9 = vld [vmem:[#allocation4 + $0x30] sm:$0xff]  ;;  %vm280_vm0 = vcmask 736256  }
  0x15   :  { %v1474_v5 = vpack.i.bf16 %v1958_v4, %v1955_v2  ;;  %v1967_v6 = vld [vmem:[#allocation4 + $0x20] sm:$0xff]  ;;  %v1969_v7 = vld [vmem:[#allocation4 + $0x28] sm:$0xff]  ;;  %s1907_s11 = smov 109   ;;  %s1908_s12 = smov 110   ;;  %v475_v10 = vld [vmem:[#allocation4 + $0x38] sm:$0xff]  ;;  %vm254_vm1 = vcmask 744448  }
  0x16   :  { %1455 = vrot.lane.b32.xlu0 %v1454_v3, %s1903_s2  ;;  %1465 = vrot.lane.b32.xlu1 %v1454_v3, %s1904_s3  ;;  %v1489_v8 = vpack.i.bf16 %v1969_v7, %v1967_v6  ;;  %s1909_s13 = smov 126   ;;  %s1910_s14 = smov 127   ;;  %v1539_v11 = vpack.i.bf16 %v475_v10, %v1983_v9  ;;  %vm228_vm2 = vcmask 752640   ;;  %vm202_vm3 = vcmask 883712   ;;  %v2060_v1 = vld [vmem:[#allocation9] sm:$0xff] }
  0x17   :  { %1475 = vrot.lane.b32.xlu2 %v1474_v5, %s1903_s2  ;;  %vm176_vm4 = vcmask 891904   ;;  %vm150_vm5 = vcmask 900096   ;;  %vm124_vm6 = vcmask 1031168   ;;  %vm98_vm7 = vcmask 1039360   ;;  %s1911_s15 = smov 19   ;;  %s1913_s16 = smov [#allocation12]  }
  0x18   :  { %vm552_vm8 = vcmask 588800   ;;  %vm718_vm9 = vcmask 154624   ;;  %vm725_vm10 = vcmask 1047704   ;;  %s1406_s17 = sshll.u32 %s1913_s16, 4  ;;  %s1408_s20 = sshll.u32 %s2462_s4, 4  ;;  %s1407_s17 = int_to_ptr.vmem [resolvable:$true] %s1406_s17  ;;  %s1409_s20 = int_to_ptr.hbm [resolvable:$true] %s1408_s20 }
  0x19   :  { %s1914_s21 = smov 384   ;;  %s1915_s22 = smov 24  }
  0x1e   :  { %1460 = vrot.lane.b32.xlu0 %v1454_v3, %s1905_s9  ;;  %1470 = vrot.lane.b32.xlu1 %v1454_v3, %s1906_s10 }
  0x1f   :  { %1480 = vrot.lane.b32.xlu2 %v1454_v3, %s1907_s11 }
  0x26   :  { %1485 = vrot.lane.b32.xlu0 %v1474_v5, %s1905_s9  ;;  %1490 = vrot.lane.b32.xlu1 %v1489_v8, %s1903_s2 }
  0x27   :  { %1495 = vrot.lane.b32.xlu2 %v1454_v3, %s1908_s12 }
  0x2e   :  { %1500 = vrot.lane.b32.xlu0 %v1474_v5, %s1904_s3  ;;  %1505 = vrot.lane.b32.xlu1 %v1489_v8, %s1905_s9 }
  0x2f   :  { %1510 = vrot.lane.b32.xlu2 %v1454_v3, %s1909_s13 }
  0x36   :  { %1520 = vrot.lane.b32.xlu1 %v1489_v8, %s1904_s3  ;;  %1515 = vrot.lane.b32.xlu0 %v1474_v5, %s1906_s10 }
  0x37   :  { %1525 = vrot.lane.b32.xlu2 %v1454_v3, %s1910_s14 }
  0x3e   :  { %1535 = vrot.lane.b32.xlu1 %v1489_v8, %s1906_s10  ;;  %1530 = vrot.lane.b32.xlu0 %v1474_v5, %s1907_s11 }
  0x3f   :  { %1540 = vrot.lane.b32.xlu2 %v1539_v11, %s1903_s2 }
  0x46   :  { %1550 = vrot.lane.b32.xlu1 %v1489_v8, %s1907_s11  ;;  %1545 = vrot.lane.b32.xlu0 %v1474_v5, %s1908_s12 }
  0x47   :  { %1555 = vrot.lane.b32.xlu2 %v1539_v11, %s1905_s9 }
  0x4e   :  { %1565 = vrot.lane.b32.xlu1 %v1489_v8, %s1908_s12  ;;  %1560 = vrot.lane.b32.xlu0 %v1474_v5, %s1909_s13 }
  0x4f   :  { %1570 = vrot.lane.b32.xlu2 %v1539_v11, %s1904_s3 }
  0x56   :  { %1580 = vrot.lane.b32.xlu1 %v1489_v8, %s1909_s13  ;;  %1575 = vrot.lane.b32.xlu0 %v1474_v5, %s1910_s14 }
  0x57   :  { %1585 = vrot.lane.b32.xlu2 %v1539_v11, %s1906_s10 }
  0x5e   :  { %1595 = vrot.lane.b32.xlu1 %v1539_v11, %s1907_s11  ;;  %1590 = vrot.lane.b32.xlu0 %v1489_v8, %s1910_s14 }
  0x5f   :  { %1600 = vrot.lane.b32.xlu2 %v1539_v11, %s1908_s12 }
  0x66   :  { %1605 = vrot.lane.b32.xlu0 %v1539_v11, %s1909_s13  ;;  %1610 = vrot.lane.b32.xlu1 %v1539_v11, %s1910_s14 }
  0x71   :  { %v1476_v12 = vpop.permute.xlu2 %1475 }
  0x72   :  { %v1477_v13 = vunpack.i.l.bf16 %v1476_v12  ;;  %v1478_v14 = vunpack.i.h.bf16 %v1476_v12 }
  0x74   :  { %v281_v15 = vsel %vm280_vm0, %v1477_v13, %v1478_v14 }
  0x75   :  { %563 = vmatpush.msra.mxu0 %v281_v15 }
  0x79   :  { %v2004_v16 = vpop.permute.xlu2 %1480 }
  0x7a   :  { %v1483_v33 = vunpack.i.h.bf16 %v2004_v16  ;;  %v1482_v34 = vunpack.i.l.bf16 %v2004_v16 }
  0x7c   :  { %v179_v40 = vsel %vm176_vm4, %v1482_v34, %v1483_v33 }
  0x81   :  { %v2006_v17 = vpop.permute.xlu2 %1495 }
  0x82   :  { %v1498_v38 = vunpack.i.h.bf16 %v2006_v17  ;;  %v1497_v39 = vunpack.i.l.bf16 %v2006_v17 }
  0x84   :  { %v153_v52 = vsel %vm150_vm5, %v1497_v39, %v1498_v38 }
  0x88   :  { %v1456_v18 = vpop.permute.xlu0 %1455  ;;  %v2008_v19 = vpop.permute.xlu1 %1465 }
  0x89   :  { %v1458_v20 = vunpack.i.h.bf16 %v1456_v18  ;;  %v1457_v21 = vunpack.i.l.bf16 %v1456_v18  ;;  %v1468_v24 = vunpack.i.h.bf16 %v2008_v19  ;;  %v1467_v25 = vunpack.i.l.bf16 %v2008_v19  ;;  %v2014_v26 = vpop.permute.xlu2 %1510 }
  0x8a   :  { %v1513_v43 = vunpack.i.h.bf16 %v2014_v26  ;;  %v1512_v44 = vunpack.i.l.bf16 %v2014_v26 }
  0x8b   :  { %v282_v22 = vsel %vm280_vm0, %v1478_v14, %v1457_v21  ;;  %v283_v23 = vsel %vm280_vm0, %v1457_v21, %v1458_v20  ;;  %v231_v36 = vsel %vm228_vm2, %v1467_v25, %v1468_v24 }
  0x8c   :  { %583 = vmatpush.msra.mxu1 %v282_v22  ;;  %603 = vmatpush.msra.mxu2 %v283_v23  ;;  %v127_v56 = vsel %vm124_vm6, %v1512_v44, %v1513_v43 }
  0x90   :  { %v1461_v27 = vpop.permute.xlu0 %1460  ;;  %v2016_v28 = vpop.permute.xlu1 %1470 }
  0x91   :  { %v1463_v29 = vunpack.i.h.bf16 %v1461_v27  ;;  %v1462_v30 = vunpack.i.l.bf16 %v1461_v27  ;;  %v1473_v31 = vunpack.i.h.bf16 %v2016_v28  ;;  %v1472_v32 = vunpack.i.l.bf16 %v2016_v28  ;;  %v2038_v49 = vpop.permute.xlu2 %1525 }
  0x92   :  { %v1528_v50 = vunpack.i.h.bf16 %v2038_v49  ;;  %v1527_v51 = vunpack.i.l.bf16 %v2038_v49 }
  0x93   :  { %v257_v35 = vsel %vm254_vm1, %v1462_v30, %v1463_v29  ;;  %v205_v37 = vsel %vm202_vm3, %v1472_v32, %v1473_v31 }
  0x94   :  { %604 = vmatpush.msra.mxu2 %v257_v35  ;;  %v101_v57 = vsel %vm98_vm7, %v1527_v51, %v1528_v50 }
  0x96   :  { %605 = vmatpush.msra.mxu2 %v231_v36 }
  0x98   :  { %v1486_v41 = vpop.permute.xlu0 %1485  ;;  %v2032_v42 = vpop.permute.xlu1 %1490  ;;  %606 = vmatpush.msra.mxu2 %v205_v37 }
  0x99   :  { %v1488_v45 = vunpack.i.h.bf16 %v1486_v41  ;;  %v1487_v46 = vunpack.i.l.bf16 %v1486_v41  ;;  %v1493_v47 = vunpack.i.h.bf16 %v2032_v42  ;;  %v1492_v48 = vunpack.i.l.bf16 %v2032_v42  ;;  %v2074_v18 = vpop.permute.xlu2 %1540 }
  0x9a   :  { %607 = vmatpush.msra.mxu2 %v179_v40  ;;  %v1543_v26 = vunpack.i.h.bf16 %v2074_v18 }
  0x9b   :  { %v255_v53 = vsel %vm254_vm1, %v1487_v46, %v1488_v45  ;;  %v256_v54 = vsel %vm254_vm1, %v1488_v45, %v1462_v30  ;;  %v488_v55 = vsel %vm280_vm0, %v1492_v48, %v1493_v47 }
  0x9c   :  { %564 = vmatpush.msra.mxu0 %v255_v53  ;;  %584 = vmatpush.msra.mxu1 %v256_v54 }
  0x9d   :  { %623 = vmatpush.msra.mxu3 %v488_v55  ;;  %608 = vmatpush.msra.mxu2 %v153_v52 }
  0x9f   :  { %609 = vmatpush.msra.mxu2 %v127_v56 }
  0xa0   :  { %v1501_v58 = vpop.permute.xlu0 %1500  ;;  %v2056_v59 = vpop.permute.xlu1 %1505 }
  0xa1   :  { %v1503_v60 = vunpack.i.h.bf16 %v1501_v58  ;;  %v1502_v61 = vunpack.i.l.bf16 %v1501_v58  ;;  %v1508_v62 = vunpack.i.h.bf16 %v2056_v59  ;;  %v1507_v63 = vunpack.i.l.bf16 %v2056_v59  ;;  %610 = vmatpush.msra.mxu2 %v101_v57  ;;  %v1556_v31 = vpop.permute.xlu2 %1555 }
  0xa3   :  { %v229_v3 = vsel %vm228_vm2, %v1502_v61, %v1503_v60  ;;  %v230_v5 = vsel %vm228_vm2, %v1503_v60, %v1467_v25  ;;  %v463_v8 = vsel %vm254_vm1, %v1507_v63, %v1508_v62  ;;  %611 = vmatpush.msra.mxu2 %v1953_v0  ;;  %v1558_v63 = vunpack.i.h.bf16 %v1556_v31 }
  0xa4   :  { %565 = vmatpush.msra.mxu0 %v229_v3  ;;  %585 = vmatpush.msra.mxu1 %v230_v5 }
  0xa5   :  { %624 = vmatpush.msra.mxu3 %v463_v8  ;;  %1425 = vmatmul.msk.f32.vlgmr.msra.gmra.mxu2 %vm552_vm8, %v2060_v1 }
  0xa8   :  { %v2070_v10 = vpop.permute.xlu1 %1520  ;;  %v1516_v11 = vpop.permute.xlu0 %1515 }
  0xa9   :  { %v1523_v12 = vunpack.i.h.bf16 %v2070_v10  ;;  %v1522_v13 = vunpack.i.l.bf16 %v2070_v10  ;;  %v1518_v14 = vunpack.i.h.bf16 %v1516_v11  ;;  %v1517_v15 = vunpack.i.l.bf16 %v1516_v11  ;;  %v1571_v41 = vpop.permute.xlu2 %1570 }
  0xaa   :  { %v1557_v11 = vunpack.i.l.bf16 %v1556_v31 }
  0xab   :  { %v203_v19 = vsel %vm202_vm3, %v1517_v15, %v1518_v14  ;;  %v204_v0 = vsel %vm202_vm3, %v1518_v14, %v1472_v32  ;;  %v438_v20 = vsel %vm228_vm2, %v1522_v13, %v1523_v12  ;;  %v1573_v13 = vunpack.i.h.bf16 %v1571_v41 }
  0xac   :  { %566 = vmatpush.msra.mxu0 %v203_v19  ;;  %586 = vmatpush.msra.mxu1 %v204_v0  ;;  %v1572_v14 = vunpack.i.l.bf16 %v1571_v41 }
  0xad   :  { %625 = vmatpush.msra.mxu3 %v438_v20 }
  0xb0   :  { %v2083_v21 = vpop.permute.xlu1 %1535  ;;  %v1531_v22 = vpop.permute.xlu0 %1530 }
  0xb1   :  { %v1538_v23 = vunpack.i.h.bf16 %v2083_v21  ;;  %v1537_v24 = vunpack.i.l.bf16 %v2083_v21  ;;  %v1533_v25 = vunpack.i.h.bf16 %v1531_v22  ;;  %v1532_v27 = vunpack.i.l.bf16 %v1531_v22  ;;  %v1586_v56 = vpop.permute.xlu2 %1585 }
  0xb2   :  { %v1588_v15 = vunpack.i.h.bf16 %v1586_v56  ;;  %v1587_v19 = vunpack.i.l.bf16 %v1586_v56 }
  0xb3   :  { %v177_v28 = vsel %vm176_vm4, %v1532_v27, %v1533_v25  ;;  %v178_v29 = vsel %vm176_vm4, %v1533_v25, %v1482_v34  ;;  %v413_v30 = vsel %vm202_vm3, %v1537_v24, %v1538_v23  ;;  %v440_v24 = vsel %vm228_vm2, %v1572_v14, %v1573_v13 }
  0xb4   :  { %567 = vmatpush.msra.mxu0 %v177_v28  ;;  %587 = vmatpush.msra.mxu1 %v178_v29  ;;  %v439_v27 = vsel %vm228_vm2, %v1523_v12, %v1572_v14  ;;  %v415_v59 = vsel %vm202_vm3, %v1587_v19, %v1588_v15 }
  0xb5   :  { %626 = vmatpush.msra.mxu3 %v413_v30  ;;  %v414_v30 = vsel %vm202_vm3, %v1538_v23, %v1587_v19 }
  0xb8   :  { %v2094_v32 = vpop.permute.xlu1 %1550  ;;  %v1546_v33 = vpop.permute.xlu0 %1545 }
  0xb9   :  { %v1553_v35 = vunpack.i.h.bf16 %v2094_v32  ;;  %v1552_v36 = vunpack.i.l.bf16 %v2094_v32  ;;  %v1548_v37 = vunpack.i.h.bf16 %v1546_v33  ;;  %v1547_v38 = vunpack.i.l.bf16 %v1546_v33  ;;  %v1601_v42 = vpop.permute.xlu2 %1600 }
  0xba   :  { %v1603_v28 = vunpack.i.h.bf16 %v1601_v42  ;;  %v1602_v29 = vunpack.i.l.bf16 %v1601_v42 }
  0xbb   :  { %v151_v16 = vsel %vm150_vm5, %v1547_v38, %v1548_v37  ;;  %v152_v34 = vsel %vm150_vm5, %v1548_v37, %v1497_v39  ;;  %v388_v40 = vsel %vm176_vm4, %v1552_v36, %v1553_v35 }
  0xbc   :  { %568 = vmatpush.msra.mxu0 %v151_v16  ;;  %588 = vmatpush.msra.mxu1 %v152_v34  ;;  %v365_v12 = vsel %vm150_vm5, %v1602_v29, %v1603_v28 }
  0xbd   :  { %627 = vmatpush.msra.mxu3 %v388_v40  ;;  %v75_v40 = vld [vmem:[#allocation7] sm:$0x3f] }
  0xbe   :  { %v685_v41 = vperm.slane %v75_v40, 2 }
  0xc0   :  { %v2105_v43 = vpop.permute.xlu1 %1565  ;;  %v1561_v45 = vpop.permute.xlu0 %1560 }
  0xc1   :  { %v1568_v46 = vunpack.i.h.bf16 %v2105_v43  ;;  %v1567_v48 = vunpack.i.l.bf16 %v2105_v43  ;;  %v1563_v50 = vunpack.i.h.bf16 %v1561_v45  ;;  %v1562_v52 = vunpack.i.l.bf16 %v1561_v45 }
  0xc3   :  { %v125_v17 = vsel %vm124_vm6, %v1562_v52, %v1563_v50  ;;  %v126_v39 = vsel %vm124_vm6, %v1563_v50, %v1512_v44  ;;  %v363_v53 = vsel %vm150_vm5, %v1567_v48, %v1568_v46  ;;  %v1542_v44 = vunpack.i.l.bf16 %v2074_v18 }
  0xc4   :  { %569 = vmatpush.msra.mxu0 %v125_v17  ;;  %589 = vmatpush.msra.mxu1 %v126_v39  ;;  %v465_v18 = vsel %vm254_vm1, %v1557_v11, %v1558_v63  ;;  %v364_v23 = vsel %vm150_vm5, %v1568_v46, %v1602_v29  ;;  %v1912_v48 = vmov 0.0   ;;  %v683_v50 = vperm.slane %v75_v40, 0 }
  0xc5   :  { %628 = vmatpush.msra.mxu3 %v363_v53  ;;  %v489_v49 = vsel %vm280_vm0, %v1493_v47, %v1542_v44  ;;  %704 = vst [vmem:[#allocation3 + $0x18] sm:$0xff] %v1912_v48 }
  0xc6   :  { %701 = vst [vmem:[#allocation3] sm:$0xff] %v1912_v48 }
  0xc7   :  { %705 = vst [vmem:[#allocation3 + $0x20] sm:$0xff] %v1912_v48 }
  0xc8   :  { %v2116_v54 = vpop.permute.xlu1 %1580  ;;  %v1576_v55 = vpop.permute.xlu0 %1575  ;;  %708 = vst [vmem:[#allocation3 + $0x38] sm:$0xff] %v1912_v48 }
  0xc9   :  { %v1583_v57 = vunpack.i.h.bf16 %v2116_v54  ;;  %v1582_v58 = vunpack.i.l.bf16 %v2116_v54  ;;  %v1578_v60 = vunpack.i.h.bf16 %v1576_v55  ;;  %v1577_v61 = vunpack.i.l.bf16 %v1576_v55 }
  0xca   :  { %v686_v54 = vperm.slane %v75_v40, 3 }
  0xcb   :  { %v99_v3 = vsel %vm98_vm7, %v1577_v61, %v1578_v60  ;;  %v100_v5 = vsel %vm98_vm7, %v1578_v60, %v1527_v51  ;;  %v338_v8 = vsel %vm124_vm6, %v1582_v58, %v1583_v57  ;;  %v490_v51 = vsel %vm280_vm0, %v1542_v44, %v1543_v26 }
  0xcc   :  { %570 = vmatpush.msra.mxu0 %v99_v3  ;;  %590 = vmatpush.msra.mxu1 %v100_v5  ;;  %v688_v58 = vperm.slane %v75_v40, 5 }
  0xcd   :  { %629 = vmatpush.msra.mxu3 %v338_v8 }
  0xce   :  { %571 = vmatpush.msra.mxu0 %v1955_v2  ;;  %591 = vmatpush.msra.mxu1 %v1958_v4  ;;  %v464_v2 = vsel %vm254_vm1, %v1508_v62, %v1557_v11 }
  0xcf   :  { %1424 = vmatmul.msk.f32.vlgmr.msra.gmra.mxu1 %vm552_vm8, %v2060_v1  ;;  %1423 = vmatmul.msk.f32.vlgmr.msra.gmra.mxu0 %vm552_vm8, %v2060_v1 }
  0xd0   :  { %643 = vmatpush.msrb.mxu0 %v489_v49  ;;  %663 = vmatpush.msrb.mxu1 %v490_v51  ;;  %v1596_v0 = vpop.permute.xlu1 %1595  ;;  %v1591_v20 = vpop.permute.xlu0 %1590 }
  0xd1   :  { %v1598_v4 = vunpack.i.h.bf16 %v1596_v0  ;;  %v1593_v47 = vunpack.i.h.bf16 %v1591_v20  ;;  %v1592_v22 = vunpack.i.l.bf16 %v1591_v20  ;;  %v1597_v25 = vunpack.i.l.bf16 %v1596_v0 }
  0xd2   :  { %644 = vmatpush.msrb.mxu0 %v464_v2  ;;  %664 = vmatpush.msrb.mxu1 %v465_v18 }
  0xd3   :  { %v313_v62 = vsel %vm98_vm7, %v1592_v22, %v1593_v47  ;;  %v390_v31 = vsel %vm176_vm4, %v1597_v25, %v1598_v4  ;;  %v389_v10 = vsel %vm176_vm4, %v1553_v35, %v1597_v25 }
  0xd4   :  { %645 = vmatpush.msrb.mxu0 %v439_v27  ;;  %665 = vmatpush.msrb.mxu1 %v440_v24 }
  0xd5   :  { %630 = vmatpush.msra.mxu3 %v313_v62 }
  0xd6   :  { %646 = vmatpush.msrb.mxu0 %v414_v30  ;;  %666 = vmatpush.msrb.mxu1 %v415_v59 }
  0xd7   :  { %631 = vmatpush.msra.mxu3 %v1967_v6 }
  0xd8   :  { %647 = vmatpush.msrb.mxu0 %v389_v10  ;;  %1426 = vmatmul.msk.f32.vlgmr.msra.gmra.mxu3 %vm552_vm8, %v2060_v1  ;;  %v1606_v21 = vpop.permute.xlu0 %1605  ;;  %v1611_v33 = vpop.permute.xlu1 %1610 }
  0xd9   :  { %667 = vmatpush.msrb.mxu1 %v390_v31  ;;  %v1608_v36 = vunpack.i.h.bf16 %v1606_v21  ;;  %v1607_v37 = vunpack.i.l.bf16 %v1606_v21  ;;  %v1613_v32 = vunpack.i.h.bf16 %v1611_v33  ;;  %v1612_v35 = vunpack.i.l.bf16 %v1611_v33 }
  0xda   :  { %648 = vmatpush.msrb.mxu0 %v364_v23 }
  0xdb   :  { %668 = vmatpush.msrb.mxu1 %v365_v12  ;;  %v339_v6 = vsel %vm124_vm6, %v1583_v57, %v1607_v37  ;;  %v340_v38 = vsel %vm124_vm6, %v1607_v37, %v1608_v36  ;;  %v314_v16 = vsel %vm98_vm7, %v1593_v47, %v1612_v35  ;;  %v315_v34 = vsel %vm98_vm7, %v1612_v35, %v1613_v32 }
  0xdc   :  { %649 = vmatpush.msrb.mxu0 %v339_v6  ;;  %v687_v57 = vperm.slane %v75_v40, 4 }
  0xdd   :  { %669 = vmatpush.msrb.mxu1 %v340_v38 }
  0xde   :  { %650 = vmatpush.msrb.mxu0 %v314_v16 }
  0xdf   :  { %670 = vmatpush.msrb.mxu1 %v315_v34 }
  0xe0   :  { %651 = vmatpush.msrb.mxu0 %v1969_v7  ;;  %v684_v7 = vperm.slane %v75_v40, 1 }
  0xe1   :  { %671 = vmatpush.msrb.mxu1 %v1983_v9  ;;  %1427 = vmatmul.msk.f32.vlgmr.msrb.gmra.mxu0 %vm552_vm8, %v2060_v1 }
  0xe2   :  { %1428 = vmatmul.msk.f32.vlgmr.msrb.gmra.mxu1 %vm552_vm8, %v2060_v1 }
 0x128   :  { %v613_v43 = vpop.f32.mrf.mxu2 }
 0x129   :  { %v678_v45 = vmax.f32 %v613_v43, 0.0 }
 0x12b   :  { %v697_v46 = vmul.f32 %v685_v41, %v678_v45 }
 0x12d   :  { %716 = vrot.lane.b32.xlu1 %v697_v46, %s1911_s15 }
 0x14c   :  { %v593_v9 = vpop.f32.mrf.mxu1  ;;  %v573_v17 = vpop.f32.mrf.mxu0 }
 0x14d   :  { %v677_v52 = vmax.f32 %v593_v9, 0.0  ;;  %v676_v39 = vmax.f32 %v573_v17, 0.0 }
 0x14f   :  { %v696_v1 = vmul.f32 %v684_v7, %v677_v52  ;;  %v695_v53 = vmul.f32 %v683_v50, %v676_v39 }
 0x151   :  { %714 = vrot.lane.b32.xlu0 %v696_v1, %s1911_s15  ;;  %712 = vrot.lane.b32.xlu2 %v695_v53, %s1911_s15 }
 0x15b   :  { %v633_v55 = vpop.f32.mrf.mxu3 }
 0x15c   :  { %v679_v56 = vmax.f32 %v633_v55, 0.0 }
 0x15e   :  { %v698_v60 = vmul.f32 %v686_v54, %v679_v56  ;;  %v653_v61 = vpop.f32.mrf.mxu0 }
 0x15f   :  { %v673_v26 = vpop.f32.mrf.mxu1  ;;  %v680_v44 = vmax.f32 %v653_v61, 0.0 }
 0x160   :  { %v681_v63 = vmax.f32 %v673_v26, 0.0  ;;  %733 = vrot.lane.b32.xlu2 %v698_v60, %s1911_s15 }
 0x161   :  { %v699_v3 = vmul.f32 %v687_v57, %v680_v44 }
 0x162   :  { %v700_v5 = vmul.f32 %v688_v58, %v681_v63 }
 0x163   :  { %735 = vrot.lane.b32.xlu0 %v699_v3, %s1911_s15 }
 0x164   :  { %737 = vrot.lane.b32.xlu1 %v700_v5, %s1911_s15 }
 0x19f   :  { %v717_v8 = vpop.permute.xlu1 %716 }
 0x1a0   :  { %729 = vst.msk [vmem:[#allocation3 + $0x18] sm:$0xff] %vm718_vm9, %v717_v8 }
 0x1a7   :  { %v933_v0 = vld [vmem:[#allocation3 + $0x18] sm:$0xff] }
 0x1ab   :  { %v713_v11 = vpop.permute.xlu2 %712 }
 0x1ac   :  { %726 = vst.msk [vmem:[#allocation3] sm:$0xff] %vm725_vm10, %v713_v11 }
 0x1b3   :  { %v2182_v14 = vld [vmem:[#allocation3] sm:$0xff] }
 0x1ba   :  { %v734_v13 = vpop.permute.xlu2 %733 }
 0x1bb   :  { %745 = vst.msk [vmem:[#allocation3 + $0x20] sm:$0xff] %vm725_vm10, %v734_v13 }
 0x1c2   :  { %v2195_v19 = vld [vmem:[#allocation3 + $0x20] sm:$0xff] }
 0x1c3   :  { %v715_v49 = vpop.permute.xlu0 %714  ;;  %v1654_v20 = vpack.i.bf16 %v2195_v19, %v933_v0 }
 0x1c4   :  { %v2185_v15 = vsel %vm718_vm9, %v715_v49, %v717_v8  ;;  %v2188_v51 = vsel %vm718_vm9, %v713_v11, %v715_v49  ;;  %v2301_v49 = vld [vmem:[#allocation10] sm:$0xff] }
 0x1c5   :  { %v1634_v18 = vpack.i.bf16 %v2188_v51, %v2182_v14  ;;  %v1679_v22 = vpack.i.bf16 %v933_v0, %v2185_v15 }
 0x1c7   :  { %1635 = vrot.lane.b32.xlu0 %v1634_v18, %s1904_s3  ;;  %1620 = vrot.lane.b32.xlu1 %v1634_v18, %s1909_s13 }
 0x1c8   :  { %1615 = vrot.lane.b32.xlu2 %v1634_v18, %s1910_s14 }
 0x1cf   :  { %1630 = vrot.lane.b32.xlu1 %v1634_v18, %s1905_s9  ;;  %1655 = vrot.lane.b32.xlu0 %v1654_v20, %s1903_s2 }
 0x1d0   :  { %1625 = vrot.lane.b32.xlu2 %v1634_v18, %s1903_s2 }
 0x1d5   :  { %v736_v4 = vpop.permute.xlu0 %735 }
 0x1d6   :  { %v738_v2 = vpop.permute.xlu1 %737  ;;  %v2203_v42 = vsel %vm718_vm9, %v734_v13, %v736_v4 }
 0x1d7   :  { %748 = vst.msk [vmem:[#allocation3 + $0x38] sm:$0xff] %vm718_vm9, %v738_v2  ;;  %v2206_v47 = vsel %vm718_vm9, %v736_v4, %v738_v2  ;;  %1645 = vrot.lane.b32.xlu1 %v1634_v18, %s1907_s11  ;;  %1670 = vrot.lane.b32.xlu0 %v1654_v20, %s1906_s10  ;;  %v1684_v24 = vpack.i.bf16 %v2203_v42, %v2185_v15 }
 0x1d8   :  { %1640 = vrot.lane.b32.xlu2 %v1634_v18, %s1906_s10  ;;  %v1759_v28 = vpack.i.bf16 %v2206_v47, %v2203_v42 }
 0x1de   :  { %v964_v25 = vld [vmem:[#allocation3 + $0x38] sm:$0xff] }
 0x1df   :  { %1650 = vrot.lane.b32.xlu1 %v1634_v18, %s1908_s12  ;;  %1680 = vrot.lane.b32.xlu0 %v1679_v22, %s1910_s14  ;;  %v1709_v27 = vpack.i.bf16 %v964_v25, %v2206_v47 }
 0x1e0   :  { %1660 = vrot.lane.b32.xlu2 %v1654_v20, %s1905_s9 }
 0x1e7   :  { %1665 = vrot.lane.b32.xlu1 %v1654_v20, %s1904_s3  ;;  %1685 = vrot.lane.b32.xlu0 %v1684_v24, %s1903_s2 }
 0x1e8   :  { %1675 = vrot.lane.b32.xlu2 %v1654_v20, %s1907_s11 }
 0x1ef   :  { %975 = vrot.lane.b32.xlu1 %v964_v25, %s1910_s14  ;;  %1700 = vrot.lane.b32.xlu0 %v1684_v24, %s1906_s10 }
 0x1f0   :  { %1690 = vrot.lane.b32.xlu2 %v1684_v24, %s1905_s9 }
 0x1f7   :  { %1695 = vrot.lane.b32.xlu1 %v1684_v24, %s1904_s3  ;;  %1710 = vrot.lane.b32.xlu0 %v1709_v27, %s1903_s2 }
 0x1f8   :  { %1705 = vrot.lane.b32.xlu2 %v1684_v24, %s1907_s11 }
 0x1ff   :  { %1720 = vrot.lane.b32.xlu0 %v1709_v27, %s1905_s9  ;;  %1725 = vrot.lane.b32.xlu1 %v1684_v24, %s1909_s13 }
 0x200   :  { %1715 = vrot.lane.b32.xlu2 %v1684_v24, %s1908_s12 }
 0x207   :  { %1740 = vrot.lane.b32.xlu0 %v1709_v27, %s1907_s11  ;;  %1735 = vrot.lane.b32.xlu1 %v1709_v27, %s1906_s10 }
 0x208   :  { %1730 = vrot.lane.b32.xlu2 %v1709_v27, %s1904_s3 }
 0x20f   :  { %1755 = vrot.lane.b32.xlu1 %v1709_v27, %s1909_s13  ;;  %1760 = vrot.lane.b32.xlu0 %v1759_v28, %s1910_s14 }
 0x210   :  { %1745 = vrot.lane.b32.xlu2 %v1709_v27, %s1908_s12 }
 0x217   :  { %969 = vrot.lane.b32.xlu1 %v2195_v19, %s1910_s14  ;;  %1765 = vrot.lane.b32.xlu0 %v1654_v20, %s1909_s13 }
 0x218   :  { %1750 = vrot.lane.b32.xlu2 %v1654_v20, %s1908_s12 }
 0x222   :  { %v2242_v59 = vpop.permute.xlu2 %1615 }
 0x223   :  { %v1618_v56 = vunpack.i.h.bf16 %v2242_v59  ;;  %v1617_v57 = vunpack.i.l.bf16 %v2242_v59 }
 0x225   :  { %v771_v61 = vsel %vm98_vm7, %v1617_v57, %v1618_v56 }
 0x22a   :  { %v1626_v62 = vpop.permute.xlu2 %1625 }
 0x22b   :  { %v1628_v29 = vunpack.i.h.bf16 %v1626_v62  ;;  %v1627_v30 = vunpack.i.l.bf16 %v1626_v62 }
 0x22d   :  { %v946_v31 = vsel %vm280_vm0, %v1627_v30, %v1628_v29 }
 0x22e   :  { %1226 = vmatpush.msrb.mxu2 %v946_v31 }
 0x232   :  { %v2245_v10 = vpop.permute.xlu2 %1640 }
 0x233   :  { %v1643_v16 = vunpack.i.h.bf16 %v2245_v10  ;;  %v1642_v34 = vunpack.i.l.bf16 %v2245_v10 }
 0x235   :  { %v871_v43 = vsel %vm202_vm3, %v1642_v34, %v1643_v16  ;;  %v1341_v34 = vld [vmem:[#allocation4 + $0x10] sm:$0xff] }
 0x236   :  { %1351 = vrot.lane.b32.xlu1 %v1341_v34, %s1907_s11 }
 0x239   :  { %v2247_v12 = vpop.permute.xlu0 %1635  ;;  %v2249_v21 = vpop.permute.xlu1 %1620 }
 0x23a   :  { %v2251_v23 = vpop.permute.xlu2 %1660  ;;  %v1638_v37 = vunpack.i.h.bf16 %v2247_v12  ;;  %v1637_v32 = vunpack.i.l.bf16 %v2247_v12  ;;  %v1623_v39 = vunpack.i.h.bf16 %v2249_v21  ;;  %v1622_v1 = vunpack.i.l.bf16 %v2249_v21 }
 0x23b   :  { %v1662_v0 = vunpack.i.l.bf16 %v2251_v23  ;;  %v1663_v22 = vunpack.i.h.bf16 %v2251_v23 }
 0x23c   :  { %v896_v41 = vsel %vm228_vm2, %v1637_v32, %v1638_v37  ;;  %v796_v60 = vsel %vm124_vm6, %v1622_v1, %v1623_v39 }
 0x241   :  { %v1631_v33 = vpop.permute.xlu1 %1630  ;;  %v1656_v36 = vpop.permute.xlu0 %1655 }
 0x242   :  { %v1633_v35 = vunpack.i.h.bf16 %v1631_v33  ;;  %v1632_v6 = vunpack.i.l.bf16 %v1631_v33  ;;  %v2255_v38 = vpop.permute.xlu2 %1675  ;;  %v1658_v26 = vunpack.i.h.bf16 %v1656_v36  ;;  %v1657_v3 = vunpack.i.l.bf16 %v1656_v36 }
 0x243   :  { %v1677_v12 = vunpack.i.l.bf16 %v2255_v38 }
 0x244   :  { %v921_v40 = vsel %vm254_vm1, %v1632_v6, %v1633_v35 }
 0x245   :  { %1227 = vmatpush.msrb.mxu2 %v921_v40  ;;  %v1340_v40 = vld [vmem:[#allocation4 + $0x8] sm:$0xff] }
 0x246   :  { %1349 = vrot.lane.b32.xlu0 %v1340_v40, %s1907_s11  ;;  %v1342_v40 = vld [vmem:[#allocation4 + $0x18] sm:$0xff] }
 0x247   :  { %1228 = vmatpush.msrb.mxu2 %v896_v41 }
 0x249   :  { %v2266_v45 = vpop.permute.xlu1 %1645  ;;  %v2268_v46 = vpop.permute.xlu0 %1670  ;;  %1229 = vmatpush.msrb.mxu2 %v871_v43 }
 0x24a   :  { %v1648_v48 = vunpack.i.h.bf16 %v2266_v45  ;;  %v1647_v7 = vunpack.i.l.bf16 %v2266_v45  ;;  %v2272_v9 = vpop.permute.xlu2 %1690  ;;  %v1672_v41 = vunpack.i.l.bf16 %v2268_v46 }
 0x24b   :  { %v1692_v5 = vunpack.i.l.bf16 %v2272_v9  ;;  %v1693_v18 = vunpack.i.h.bf16 %v2272_v9 }
 0x24c   :  { %v846_v50 = vsel %vm176_vm4, %v1647_v7, %v1648_v48 }
 0x24d   :  { %1230 = vmatpush.msrb.mxu2 %v846_v50  ;;  %v922_v24 = vsel %vm254_vm1, %v1633_v35, %v1692_v5  ;;  %v1127_v25 = vsel %vm254_vm1, %v1663_v22, %v1693_v18 }
 0x251   :  { %v2277_v52 = vpop.permute.xlu1 %1650  ;;  %v2279_v17 = vpop.permute.xlu0 %1680 }
 0x252   :  { %v1653_v53 = vunpack.i.h.bf16 %v2277_v52  ;;  %v1652_v54 = vunpack.i.l.bf16 %v2277_v52  ;;  %v2285_v55 = vpop.permute.xlu2 %1705 }
 0x253   :  { %v1707_v43 = vunpack.i.l.bf16 %v2285_v55 }
 0x254   :  { %v821_v58 = vsel %vm150_vm5, %v1652_v54, %v1653_v53 }
 0x255   :  { %1231 = vmatpush.msrb.mxu2 %v821_v58  ;;  %v1673_v58 = vunpack.i.h.bf16 %v2268_v46 }
 0x257   :  { %1232 = vmatpush.msrb.mxu2 %v796_v60  ;;  %v1708_v60 = vunpack.i.h.bf16 %v2285_v55 }
 0x259   :  { %v1666_v44 = vpop.permute.xlu1 %1665  ;;  %v1686_v63 = vpop.permute.xlu0 %1685  ;;  %1233 = vmatpush.msrb.mxu2 %v771_v61 }
 0x25a   :  { %v1688_v8 = vunpack.i.h.bf16 %v1686_v63  ;;  %v1687_v11 = vunpack.i.l.bf16 %v1686_v63  ;;  %v2299_v13 = vpop.permute.xlu2 %1715  ;;  %v1667_v30 = vunpack.i.l.bf16 %v1666_v44  ;;  %v847_v63 = vsel %vm176_vm4, %v1648_v48, %v1707_v43  ;;  %v1371_v48 = vld [vmem:[#allocation4 + $0x28] sm:$0xff] }
 0x25b   :  { %1234 = vmatpush.msrb.mxu2 %v2182_v14  ;;  %v923_v14 = vsel %vm254_vm1, %v1692_v5, %v1662_v0  ;;  %1380 = vrot.lane.b32.xlu1 %v1371_v48, %s1907_s11 }
 0x25c   :  { %v947_v20 = vsel %vm280_vm0, %v1628_v29, %v1687_v11  ;;  %v948_v2 = vsel %vm280_vm0, %v1687_v11, %v1657_v3  ;;  %v1152_v4 = vsel %vm280_vm0, %v1658_v26, %v1688_v8  ;;  %1429 = vmatmul.msk.f32.vlgmr.msrb.gmra.mxu2 %vm552_vm8, %v2301_v49  ;;  %v1668_v29 = vunpack.i.h.bf16 %v1666_v44 }
 0x25d   :  { %1246 = vmatpush.msrb.mxu3 %v947_v20  ;;  %1266 = vmatpush.msra.mxu0 %v948_v2  ;;  %v1678_v44 = vunpack.i.h.bf16 %v2255_v38  ;;  %v848_v3 = vsel %vm176_vm4, %v1707_v43, %v1677_v12  ;;  %v1370_v20 = vld [vmem:[#allocation4 + $0x20] sm:$0xff]  ;;  %v1718_v2 = vunpack.i.h.bf16 %v2299_v13 }
 0x25e   :  { %1286 = vmatpush.msra.mxu1 %v1152_v4  ;;  %1378 = vrot.lane.b32.xlu0 %v1370_v20, %s1907_s11 }
 0x25f   :  { %1247 = vmatpush.msrb.mxu3 %v922_v24  ;;  %1267 = vmatpush.msra.mxu0 %v923_v14  ;;  %v1052_v38 = vsel %vm176_vm4, %v1678_v44, %v1708_v60  ;;  %v1339_v24 = vld [vmem:[#allocation4] sm:$0xff] }
 0x260   :  { %1287 = vmatpush.msra.mxu1 %v1127_v25  ;;  %1347 = vrot.lane.b32.xlu2 %v1339_v24, %s1907_s11 }
 0x261   :  { %v2317_v27 = vpop.permute.xlu1 %975  ;;  %v2319_v28 = vpop.permute.xlu0 %1700 }
 0x262   :  { %v2321_v62 = vpop.permute.xlu2 %1730  ;;  %v1702_v33 = vunpack.i.l.bf16 %v2319_v28  ;;  %v1703_v7 = vunpack.i.h.bf16 %v2319_v28 }
 0x263   :  { %v1732_v14 = vunpack.i.l.bf16 %v2321_v62 }
 0x264   :  { %v872_v61 = vsel %vm202_vm3, %v1643_v16, %v1702_v33  ;;  %v873_v26 = vsel %vm202_vm3, %v1702_v33, %v1672_v41  ;;  %v1077_v46 = vsel %vm202_vm3, %v1673_v58, %v1703_v7  ;;  %v1682_v16 = vunpack.i.l.bf16 %v2279_v17 }
 0x266   :  { %v772_v21 = vsel %vm98_vm7, %v1618_v56, %v1682_v16  ;;  %v1373_v56 = vld [vmem:[#allocation4 + $0x38] sm:$0xff] }
 0x267   :  { %1384 = vrot.lane.b32.xlu0 %v1373_v56, %s1907_s11 }
 0x268   :  { %1353 = vrot.lane.b32.xlu2 %v1342_v40, %s1907_s11 }
 0x269   :  { %v2323_v31 = vpop.permute.xlu1 %1695  ;;  %v2325_v23 = vpop.permute.xlu0 %1710 }
 0x26a   :  { %v1698_v36 = vunpack.i.h.bf16 %v2323_v31  ;;  %v1697_v32 = vunpack.i.l.bf16 %v2323_v31  ;;  %v1712_v35 = vunpack.i.l.bf16 %v2325_v23  ;;  %v2331_v6 = vpop.permute.xlu2 %1745 }
 0x26b   :  { %v1748_v43 = vunpack.i.h.bf16 %v2331_v6 }
 0x26c   :  { %v897_v50 = vsel %vm228_vm2, %v1638_v37, %v1697_v32  ;;  %v898_v1 = vsel %vm228_vm2, %v1697_v32, %v1667_v30  ;;  %v1102_v54 = vsel %vm228_vm2, %v1668_v29, %v1698_v36  ;;  %v1153_v57 = vsel %vm280_vm0, %v1688_v8, %v1712_v35 }
 0x26d   :  { %1248 = vmatpush.msrb.mxu3 %v897_v50  ;;  %1268 = vmatpush.msra.mxu0 %v898_v1  ;;  %v1717_v37 = vunpack.i.l.bf16 %v2299_v13  ;;  %v1713_v13 = vunpack.i.h.bf16 %v2325_v23  ;;  %v1103_v9 = vsel %vm228_vm2, %v1698_v36, %v1732_v14 }
 0x26e   :  { %1288 = vmatpush.msra.mxu1 %v1102_v54  ;;  %1306 = vmatpush.msra.mxu2 %v1153_v57 }
 0x26f   :  { %1249 = vmatpush.msrb.mxu3 %v872_v61  ;;  %1269 = vmatpush.msra.mxu0 %v873_v26  ;;  %v822_v45 = vsel %vm150_vm5, %v1653_v53, %v1717_v37  ;;  %v1154_v32 = vsel %vm280_vm0, %v1712_v35, %v1713_v13 }
 0x270   :  { %1289 = vmatpush.msra.mxu1 %v1077_v46 }
 0x271   :  { %v1721_v10 = vpop.permute.xlu0 %1720  ;;  %v2364_v5 = vpop.permute.xlu1 %1725  ;;  %1250 = vmatpush.msrb.mxu3 %v847_v63  ;;  %1270 = vmatpush.msra.mxu0 %v848_v3  ;;  %v1683_v3 = vunpack.i.h.bf16 %v2279_v17 }
 0x272   :  { %v1722_v8 = vunpack.i.l.bf16 %v1721_v10  ;;  %v1727_v11 = vunpack.i.l.bf16 %v2364_v5  ;;  %v1751_v0 = vpop.permute.xlu2 %1750  ;;  %1290 = vmatpush.msra.mxu1 %v1052_v38  ;;  %v1728_v50 = vunpack.i.h.bf16 %v2364_v5 }
 0x273   :  { %v1753_v4 = vunpack.i.h.bf16 %v1751_v0  ;;  %v1752_v22 = vunpack.i.l.bf16 %v1751_v0  ;;  %1251 = vmatpush.msrb.mxu3 %v822_v45 }
 0x274   :  { %v797_v52 = vsel %vm124_vm6, %v1623_v39, %v1727_v11  ;;  %v1128_v53 = vsel %vm254_vm1, %v1693_v18, %v1722_v8  ;;  %v1723_v39 = vunpack.i.h.bf16 %v1721_v10  ;;  %v1733_v18 = vunpack.i.h.bf16 %v2321_v62 }
 0x275   :  { %1252 = vmatpush.msrb.mxu3 %v797_v52  ;;  %v823_v25 = vsel %vm150_vm5, %v1717_v37, %v1752_v22  ;;  %v1027_v29 = vsel %vm150_vm5, %v1753_v4, %v1718_v2  ;;  %1307 = vmatpush.msra.mxu2 %v1128_v53  ;;  %v1747_v62 = vunpack.i.l.bf16 %v2331_v6  ;;  %v1372_v37 = vld [vmem:[#allocation4 + $0x30] sm:$0xff] }
 0x276   :  { %1271 = vmatpush.msra.mxu0 %v823_v25  ;;  %1291 = vmatpush.msra.mxu1 %v1027_v29  ;;  %v1129_v36 = vsel %vm254_vm1, %v1722_v8, %v1723_v39  ;;  %v1104_v35 = vsel %vm228_vm2, %v1732_v14, %v1733_v18 }
 0x277   :  { %1253 = vmatpush.msrb.mxu3 %v772_v21  ;;  %1308 = vmatpush.msra.mxu2 %v1103_v9  ;;  %v1029_v6 = vsel %vm150_vm5, %v1747_v62, %v1748_v43 }
 0x278   :  { %1382 = vrot.lane.b32.xlu2 %v1372_v37, %s1907_s11 }
 0x279   :  { %v1741_v30 = vpop.permute.xlu0 %1740  ;;  %v1736_v33 = vpop.permute.xlu1 %1735  ;;  %1254 = vmatpush.msrb.mxu3 %v2188_v51 }
 0x27a   :  { %v1742_v59 = vunpack.i.l.bf16 %v1741_v30  ;;  %v1737_v34 = vunpack.i.l.bf16 %v1736_v33  ;;  %v1738_v31 = vunpack.i.h.bf16 %v1736_v33  ;;  %1430 = vmatmul.msk.f32.vlgmr.msrb.gmra.mxu3 %vm552_vm8, %v2301_v49  ;;  %v1743_v23 = vunpack.i.h.bf16 %v1741_v30 }
 0x27b   :  { %1326 = vmatpush.msra.mxu3 %v1154_v32 }
 0x27c   :  { %v1078_v51 = vsel %vm202_vm3, %v1703_v7, %v1737_v34  ;;  %v1053_v41 = vsel %vm176_vm4, %v1708_v60, %v1742_v59  ;;  %v1079_v28 = vsel %vm202_vm3, %v1737_v34, %v1738_v31  ;;  %v1028_v7 = vsel %vm150_vm5, %v1718_v2, %v1747_v62 }
 0x27d   :  { %1327 = vmatpush.msra.mxu3 %v1129_v36  ;;  %1309 = vmatpush.msra.mxu2 %v1078_v51  ;;  %v1054_v57 = vsel %vm176_vm4, %v1742_v59, %v1743_v23 }
 0x27f   :  { %1328 = vmatpush.msra.mxu3 %v1104_v35  ;;  %1310 = vmatpush.msra.mxu2 %v1053_v41 }
 0x281   :  { %1329 = vmatpush.msra.mxu3 %v1079_v28  ;;  %v1756_v1 = vpop.permute.xlu1 %1755  ;;  %v1761_v54 = vpop.permute.xlu0 %1760  ;;  %1311 = vmatpush.msra.mxu2 %v1028_v7 }
 0x282   :  { %v1758_v55 = vunpack.i.h.bf16 %v1756_v1  ;;  %v1757_v58 = vunpack.i.l.bf16 %v1756_v1  ;;  %v1763_v60 = vunpack.i.h.bf16 %v1761_v54  ;;  %v1762_v12 = vunpack.i.l.bf16 %v1761_v54 }
 0x283   :  { %1330 = vmatpush.msra.mxu3 %v1054_v57 }
 0x284   :  { %v1003_v61 = vsel %vm124_vm6, %v1728_v50, %v1757_v58  ;;  %v1004_v26 = vsel %vm124_vm6, %v1757_v58, %v1758_v55  ;;  %v978_v44 = vsel %vm98_vm7, %v1762_v12, %v1763_v60  ;;  %v979_v46 = vsel %vm98_vm7, %v1763_v60, %v2317_v27 }
 0x285   :  { %1331 = vmatpush.msra.mxu3 %v1029_v6  ;;  %1312 = vmatpush.msra.mxu2 %v1003_v61 }
 0x287   :  { %1332 = vmatpush.msra.mxu3 %v1004_v26  ;;  %1313 = vmatpush.msra.mxu2 %v978_v44 }
 0x289   :  { %1333 = vmatpush.msra.mxu3 %v979_v46  ;;  %v1766_v63 = vpop.permute.xlu0 %1765  ;;  %1314 = vmatpush.msra.mxu2 %v2203_v42  ;;  %v970_v8 = vpop.permute.xlu1 %969  ;;  %v773_v42 = vsel %vm98_vm7, %v1682_v16, %v1683_v3 }
 0x28a   :  { %v1768_v10 = vunpack.i.h.bf16 %v1766_v63  ;;  %v1767_v38 = vunpack.i.l.bf16 %v1766_v63  ;;  %1433 = vmatmul.msk.f32.vlgmr.msra.gmra.mxu2 %vm552_vm8, %v2301_v49 }
 0x28b   :  { %1334 = vmatpush.msra.mxu3 %v2206_v47  ;;  %v977_v47 = vsel %vm98_vm7, %v970_v8, %v1762_v12 }
 0x28c   :  { %1434 = vmatmul.msk.f32.vlgmr.msra.gmra.mxu3 %vm552_vm8, %v2301_v49  ;;  %v798_v27 = vsel %vm124_vm6, %v1727_v11, %v1767_v38  ;;  %v1002_v0 = vsel %vm124_vm6, %v1768_v10, %v1728_v50 }
 0x28d   :  { %1272 = vmatpush.msra.mxu0 %v798_v27  ;;  %1292 = vmatpush.msra.mxu1 %v1002_v0 }
 0x28f   :  { %1273 = vmatpush.msra.mxu0 %v773_v42  ;;  %1293 = vmatpush.msra.mxu1 %v977_v47 }
 0x291   :  { %1274 = vmatpush.msra.mxu0 %v2185_v15  ;;  %1294 = vmatpush.msra.mxu1 %v2195_v19 }
 0x292   :  { %1431 = vmatmul.msk.f32.vlgmr.msra.gmra.mxu0 %vm552_vm8, %v2301_v49  ;;  %1432 = vmatmul.msk.f32.vlgmr.msra.gmra.mxu1 %vm552_vm8, %v2301_v49 }
 0x2a8   :  { %v1352_v20 = vpop.permute.xlu1 %1351 }
 0x2b8   :  { %v1350_v11 = vpop.permute.xlu0 %1349 }
 0x2b9   :  { %v1356_v2 = vsel %vm176_vm4, %v1350_v11, %v1352_v20 }
 0x2ba   :  { %v1348_v5 = vpop.permute.xlu2 %1347 }
 0x2bb   :  { %v1355_v17 = vsel %vm176_vm4, %v1348_v5, %v1350_v11 }
 0x2c2   :  { %v1354_v4 = vpop.permute.xlu2 %1353 }
 0x2c3   :  { %v1357_v39 = vsel %vm176_vm4, %v1352_v20, %v1354_v4 }
 0x2cd   :  { %v1381_v49 = vpop.permute.xlu1 %1380 }
 0x2d0   :  { %v1379_v22 = vpop.permute.xlu0 %1378 }
 0x2d1   :  { %v1386_v30 = vsel %vm176_vm4, %v1379_v22, %v1381_v49 }
 0x2d2   :  { %v1383_v14 = vpop.permute.xlu2 %1382 }
 0x2d3   :  { %v1387_v53 = vsel %vm176_vm4, %v1381_v49, %v1383_v14 }
 0x2d9   :  { %v1385_v52 = vpop.permute.xlu0 %1384 }
 0x2da   :  { %v1388_v13 = vsel %vm176_vm4, %v1383_v14, %v1385_v52 }
 0x2df   :  { %v1236_v45 = vpop.f32.mrf.mxu2 }
 0x2e0   :  { %v1361_v16 = vadd.f32 %v1355_v17, %v1236_v45 }
 0x2e2   :  { %v1364_v48 = vmax.f32 %v1361_v16, 0.0 }
 0x2e4   :  { %1367 = vst [vmem:[#allocation12] sm:$0xff] %v1364_v48 }
 0x2fd   :  { %v1256_v15 = vpop.f32.mrf.mxu3 }
 0x2fe   :  { %v1362_v19 = vadd.f32 %v1356_v2, %v1256_v15 }
 0x300   :  { %v1365_v24 = vmax.f32 %v1362_v19, 0.0 }
 0x302   :  { %1368 = vst [vmem:[#allocation12 + $0x8] sm:$0xff] %v1365_v24 }
 0x30d   :  { %v1316_v25 = vpop.f32.mrf.mxu2 }
 0x30e   :  { %v1393_v29 = vadd.f32 %v1387_v53, %v1316_v25 }
 0x30f   :  { %v1336_v21 = vpop.f32.mrf.mxu3  ;;  %v1276_v9 = vpop.f32.mrf.mxu0 }
 0x310   :  { %v1296_v18 = vpop.f32.mrf.mxu1  ;;  %v1394_v33 = vadd.f32 %v1388_v13, %v1336_v21  ;;  %v1363_v32 = vadd.f32 %v1357_v39, %v1276_v9  ;;  %v1396_v34 = vmax.f32 %v1393_v29, 0.0 }
 0x311   :  { %v1392_v59 = vadd.f32 %v1386_v30, %v1296_v18 }
 0x312   :  { %v1397_v56 = vmax.f32 %v1394_v33, 0.0  ;;  %v1366_v31 = vmax.f32 %v1363_v32, 0.0  ;;  %1400 = vst [vmem:[#allocation12 + $0x20] sm:$0xff] %v1396_v34 }
 0x313   :  { %v1395_v36 = vmax.f32 %v1392_v59, 0.0 }
 0x314   :  { %1401 = vst [vmem:[#allocation12 + $0x28] sm:$0xff] %v1397_v56 }
 0x315   :  { %1369 = vst [vmem:[#allocation12 + $0x10] sm:$0xff] %v1366_v31 }
 0x316   :  { %1399 = vst [vmem:[#allocation12 + $0x18] sm:$0xff] %v1395_v36 }
 0x317   :  { %1414 = dma.vmem_to_hbm [thread:$0]  %s1407_s17, 768, %s1409_s20, [#allocation6], %s1914_s21, %s1914_s21, %s1915_s22  }
 0x318   :  { %1895 = dma.done.wait [#allocation6], 768  }
 0x319   :  { %1896 = vsyncadd [#allocation6], 4294966528 }
 0x31a   :  { %1419 = vsyncpa [#allocation5], 1 }
 0x31b   :  { %1420 = vsyncpa [#allocation8], 1 }
 0x31c   :  { %1421 = vsyncpa [#allocation11], 1 }
 0x31d   :  { %1422 = vsyncpa [#allocation6], 1 }

</bundles_post_ra>
